<compile_context>
chip_gen: v6e
topology: v6e:2x2x1
jax: 0.10.0
libtpu: 0.0.40
codegen_flags: <defaults>
</compile_context>

<pallas_src>
import functools

import jax
import jax.numpy as jnp
from jax.experimental import pallas as pl
from jax.experimental.pallas import tpu as pltpu


# ----------------------------------------------------------------------------
# Device introspection helpers (conservative fallbacks).
# ----------------------------------------------------------------------------
def _vmem_capacity_bytes():
    try:
        return int(pltpu.get_tpu_info().vmem_capacity_bytes)
    except Exception:
        pass
    try:
        kind = jax.devices()[0].device_kind.lower()
    except Exception:
        kind = ""
    if "v7" in kind:
        return 64 * 1024 * 1024        # v7x: 64 MiB per TensorCore
    return 128 * 1024 * 1024           # v5e / v6e


def _num_tensorcores_per_chip():
    try:
        kind = jax.devices()[0].device_kind.lower()
    except Exception:
        return 1
    return 2 if "v7" in kind else 1     # only v7x exposes 2 TCs per chip here


def _pick_time_chunk(n_steps, bb, hidden_size, vmem_limit_bytes):
    """Largest divisor of n_steps whose double-buffered blocks fit the budget."""
    # Per chunk-step DMA-resident bytes: xifo (3H) + res (H) + out (H), f32,
    # each double-buffered.
    per_step = bb * (5 * hidden_size) * 4 * 2
    budget = max(int(vmem_limit_bytes * 0.5), per_step)
    max_chunk = max(1, budget // per_step)
    best = 1
    for d in range(1, n_steps + 1):
        if n_steps % d == 0 and d <= max_chunk:
            best = d
    return best


# ----------------------------------------------------------------------------
# Pallas kernel: one ResLSTM layer, time-chunked.
#   grid = (num_batch_blocks ["parallel"], num_time_chunks ["arbitrary"])
#   xifo block : (chunk, bb, 3H)  -- x @ Wii^T + (b_ii + b_ih + b_ic)
#   res  block : (chunk, bb, H)   -- residual (raw x when F == H, else x@Wir^T)
#   w_h        : (H, 4H)          -- [Wih^T | Whh^T]
#   w_c        : (H, 4H)          -- [Wic^T | 0]
#   b_hh       : (1, H)
#   out block  : (chunk, bb, H)
#   scratch    : h, c carries (bb, H) persistent across time chunks
# ----------------------------------------------------------------------------
def _reslstm_kernel(xifo_ref, res_ref, wh_ref, wc_ref, bhh_ref, out_ref,
                    h_ref, c_ref, *, hidden_size, chunk, unroll, mxu_dtype):
    H = hidden_size
    bb = out_ref.shape[1]

    @pl.when(pl.program_id(1) == 0)
    def _():
        h_ref[...] = jnp.zeros_like(h_ref)
        c_ref[...] = jnp.zeros_like(c_ref)

    w_h = wh_ref[...]                                   # (H, 4H), loaded once
    w_c = wc_ref[...]                                   # (H, 4H), loaded once
    b_hh = jnp.broadcast_to(bhh_ref[...], (bb, H))      # broadcast hoisted

    def step(t, carry):
        h, c = carry                                    # (bb, H) each, vregs
        pre = (jnp.dot(h.astype(mxu_dtype), w_h,
                       preferred_element_type=jnp.float32)
               + jnp.dot(c.astype(mxu_dtype), w_c,
                         preferred_element_type=jnp.float32))     # (bb, 4H)

        gates = jax.nn.sigmoid(xifo_ref[t] + pre[:, :3 * H])      # one EUP pass
        ingate = gates[:, 0:H]
        forgetgate = gates[:, H:2 * H]
        outgate = gates[:, 2 * H:3 * H]
        cellgate = jnp.tanh(pre[:, 3 * H:4 * H] + b_hh)

        cy = forgetgate * c + ingate * cellgate
        hy = outgate * (jnp.tanh(cy) + res_ref[t])
        out_ref[t] = hy
        return (hy, cy)

    h, c = jax.lax.fori_loop(0, chunk, step, (h_ref[...], c_ref[...]),
                             unroll=unroll)
    h_ref[...] = h
    c_ref[...] = c


def reslstm_layer_pallas(dilated_inputs, p, *, mxu_dtype=jnp.bfloat16):
    """dilated_inputs: (T, Bp, F) float32 -> outputs (T, Bp, H) float32."""
    T, Bp, F = dilated_inputs.shape
    H = p["weight_hh"].shape[0]
    f32 = jnp.float32

    # --- Hoisted input projection (off the serial critical path). ---
    x2d = dilated_inputs.reshape(T * Bp, F)
    bias_ifo = (p["bias_ii"] + p["bias_ih"] + p["bias_ic"]).reshape(1, 3 * H)
    if mxu_dtype == jnp.float32:
        xifo = jnp.dot(x2d, p["weight_ii"].T, precision="highest") + bias_ifo
    else:
        xifo = jnp.dot(x2d.astype(mxu_dtype),
                       p["weight_ii"].T.astype(mxu_dtype),
                       preferred_element_type=f32) + bias_ifo
    xifo = xifo.astype(f32).reshape(T, Bp, 3 * H)

    if F == H:
        res = dilated_inputs                       # identity residual, no copy
    else:
        if mxu_dtype == jnp.float32:
            res = jnp.dot(x2d, p["weight_ir"].T, precision="highest")
        else:
            res = jnp.dot(x2d.astype(mxu_dtype),
                          p["weight_ir"].T.astype(mxu_dtype),
                          preferred_element_type=f32)
        res = res.astype(f32).reshape(T, Bp, H)

    # --- Packed recurrent weights (two H-row operands, no in-loop concat). ---
    w_h = jnp.concatenate([p["weight_ih"].T, p["weight_hh"].T],
                          axis=1).astype(mxu_dtype)                 # (H, 4H)
    w_c = jnp.concatenate([p["weight_ic"].T, jnp.zeros((H, H), f32)],
                          axis=1).astype(mxu_dtype)                 # (H, 4H)
    b_hh = p["bias_hh"].reshape(1, H).astype(f32)

    # --- Batch split only where there is a second TensorCore (v7x). ---
    if (_num_tensorcores_per_chip() > 1 and Bp % 2 == 0
            and (Bp // 2) % 8 == 0):
        nb, bb = 2, Bp // 2
    else:
        nb, bb = 1, Bp

    # --- VMEM budget and time-chunk size. ---
    vmem_cap = _vmem_capacity_bytes()
    vmem_limit = min(vmem_cap * 3 // 4, 96 * 1024 * 1024)
    chunk = _pick_time_chunk(T, bb, H, vmem_limit)
    nt = T // chunk
    unroll = min(chunk, 8)

    kernel = functools.partial(_reslstm_kernel, hidden_size=H, chunk=chunk,
                               unroll=unroll, mxu_dtype=mxu_dtype)

    out = pl.pallas_call(
        kernel,
        out_shape=jax.ShapeDtypeStruct((T, Bp, H), f32),
        grid_spec=pltpu.PrefetchScalarGridSpec(
            num_scalar_prefetch=0,
            grid=(nb, nt),
            in_specs=[
                pl.BlockSpec((chunk, bb, 3 * H), lambda b, t: (t, b, 0)),  # xifo
                pl.BlockSpec((chunk, bb, H), lambda b, t: (t, b, 0)),      # res
                pl.BlockSpec((H, 4 * H), lambda b, t: (0, 0)),             # w_h
                pl.BlockSpec((H, 4 * H), lambda b, t: (0, 0)),             # w_c
                pl.BlockSpec((1, H), lambda b, t: (0, 0)),                 # b_hh
            ],
            out_specs=pl.BlockSpec((chunk, bb, H), lambda b, t: (t, b, 0)),
            scratch_shapes=[pltpu.VMEM((bb, H), f32),     # h carry
                            pltpu.VMEM((bb, H), f32)],    # c carry
        ),
        compiler_params=pltpu.CompilerParams(
            dimension_semantics=("parallel", "arbitrary"),
            vmem_limit_bytes=int(vmem_limit)),
    )(xifo, res, w_h, w_c, b_hh)
    return out


# ----------------------------------------------------------------------------
# DRNN dilation plumbing.  _prepare_inputs / _split_outputs are pure reshapes
# (no strided-gather copies), mathematically identical to the torch glue.
# ----------------------------------------------------------------------------
def drnn_layer(p, inputs, rate, cell_fn):
    n_steps, batch, feat = inputs.shape
    dilated_steps = -(-n_steps // rate)
    pad = dilated_steps * rate - n_steps
    if pad:
        inputs = jnp.concatenate(
            [inputs, jnp.zeros((pad, batch, feat), inputs.dtype)], axis=0)
    # _prepare_inputs: (T'*rate, B, F) -> (T', rate*B, F) is a pure reshape.
    dilated_inputs = inputs.reshape(dilated_steps, rate * batch, feat)
    dilated_outputs = cell_fn(dilated_inputs, p)          # (T', rate*B, H)
    H = dilated_outputs.shape[-1]
    # _split_outputs + _unpad_outputs: also a pure reshape.
    interleaved = dilated_outputs.reshape(dilated_steps * rate, batch, H)
    return interleaved[:n_steps]


def drnn_forward(params_list, dilations, inputs, cell_fn):
    # inputs: (seq, batch, n_input)
    x = inputs
    per_layer_tails = []
    for p, rate in zip(params_list, dilations):
        x = drnn_layer(p, x, rate, cell_fn)
        per_layer_tails.append(x[-rate:])
    return x, per_layer_tails


# ----------------------------------------------------------------------------
# Pure-JAX reference ResLSTM layer (mirrors the PyTorch ResLSTMCell math).
# ----------------------------------------------------------------------------
def reslstm_layer_ref(dilated_inputs, p):
    T, Bp, F = dilated_inputs.shape
    H = p["weight_hh"].shape[0]
    h = jnp.zeros((Bp, H), jnp.float32)
    c = jnp.zeros((Bp, H), jnp.float32)
    dot = functools.partial(jnp.dot, precision="highest")
    outs = []
    for t in range(T):
        x = dilated_inputs[t]
        ifo = (dot(x, p["weight_ii"].T) + p["bias_ii"]
               + dot(h, p["weight_ih"].T) + p["bias_ih"]
               + dot(c, p["weight_ic"].T) + p["bias_ic"])
        i_, f_, o_ = jnp.split(ifo, 3, axis=1)
        i_, f_, o_ = jax.nn.sigmoid(i_), jax.nn.sigmoid(f_), jax.nn.sigmoid(o_)
        g = jnp.tanh(dot(h, p["weight_hh"].T) + p["bias_hh"])
        c = f_ * c + i_ * g
        r = jnp.tanh(c)
        res = x if F == H else dot(x, p["weight_ir"].T)
        h = o_ * (r + res)
        outs.append(h)
    return jnp.stack(outs)


# ----------------------------------------------------------------------------
# Deterministic parameter init (shapes from ResLSTMCell.__init__).
# ----------------------------------------------------------------------------
def init_reslstm_params(key, input_size, hidden_size):
    ks = jax.random.split(key, 9)
    H, F = hidden_size, input_size
    return {
        "weight_ii": jax.random.normal(ks[0], (3 * H, F), jnp.float32),
        "weight_ic": jax.random.normal(ks[1], (3 * H, H), jnp.float32),
        "weight_ih": jax.random.normal(ks[2], (3 * H, H), jnp.float32),
        "bias_ii": jax.random.normal(ks[3], (3 * H,), jnp.float32),
        "bias_ic": jax.random.normal(ks[4], (3 * H,), jnp.float32),
        "bias_ih": jax.random.normal(ks[5], (3 * H,), jnp.float32),
        "weight_hh": jax.random.normal(ks[6], (H, H), jnp.float32),
        "bias_hh": jax.random.normal(ks[7], (H,), jnp.float32),
        "weight_ir": jax.random.normal(ks[8], (H, F), jnp.float32),
    }


if __name__ == "__main__":
    seq, batch = 8, 2
    n_input, n_hidden, n_layers = 4, 32, 3
    dilations = (1, 2, 4)

    key = jax.random.PRNGKey(0)
    k_in, *k_layers = jax.random.split(key, n_layers + 1)

    # Scale params down a touch so gates don't fully saturate (purely cosmetic).
    params_list = []
    for i in range(n_layers):
        in_size = n_input if i == 0 else n_hidden
        p = init_reslstm_params(k_layers[i], in_size, n_hidden)
        params_list.append(jax.tree_util.tree_map(lambda a: 0.1 * a, p))

    # layout: (seq, batch, n_input)  -- time-major, batch_first=False
    x = jax.random.normal(k_in, (seq, batch, n_input), jnp.float32)

    out_ref, _ = drnn_forward(params_list, dilations, x, reslstm_layer_ref)
    out_ref = jax.block_until_ready(out_ref)

    # f32 MXU-operand path: tight check against the reference.
    cell_f32 = functools.partial(reslstm_layer_pallas, mxu_dtype=jnp.float32)
    out_f32, tails_f32 = drnn_forward(params_list, dilations, x, cell_f32)
    out_f32 = jax.block_until_ready(out_f32)
    tails_f32 = jax.block_until_ready(tails_f32)
    assert out_f32.shape == (seq, batch, n_hidden)
    assert [t.shape for t in tails_f32] == [(d, batch, n_hidden)
                                            for d in dilations]
    assert jnp.allclose(out_f32, out_ref, rtol=2e-3, atol=2e-3), (
        float(jnp.max(jnp.abs(out_f32 - out_ref))))

    # bf16 MXU-operand path (default / production): looser tolerance.
    out_bf16, tails = drnn_forward(params_list, dilations, x,
                                   reslstm_layer_pallas)
    out_bf16 = jax.block_until_ready(out_bf16)
    tails = jax.block_until_ready(tails)
    assert out_bf16.shape == (seq, batch, n_hidden)
    assert jnp.allclose(out_bf16, out_ref, rtol=5e-2, atol=5e-2), (
        float(jnp.max(jnp.abs(out_bf16 - out_ref))))

    print("KERNEL_OK")
</pallas_src>

<mosaic_0001>
module attributes {stable_mosaic.version = 11 : i64} {
  func.func @_reslstm_kernel(%arg0: i32, %arg1: i32, %arg2: memref<8x2x96xf32, #tpu.memory_space<vmem>>, %arg3: memref<8x2x32xf32, #tpu.memory_space<vmem>>, %arg4: memref<32x128xf32, #tpu.memory_space<vmem>>, %arg5: memref<32x128xf32, #tpu.memory_space<vmem>>, %arg6: memref<1x32xf32, #tpu.memory_space<vmem>>, %arg7: memref<8x2x32xf32, #tpu.memory_space<vmem>>, %arg8: memref<2x32xf32, #tpu.memory_space<vmem>>, %arg9: memref<2x32xf32, #tpu.memory_space<vmem>>) attributes {dimension_semantics = [#tpu.dimension_semantics<parallel>, #tpu.dimension_semantics<arbitrary>], iteration_bounds = array<i64: 1, 1>, scalar_prefetch = 0 : i64, scratch_operands = 2 : i64, tpu.core_type = #tpu.core_type<tc>, window_params = [{transform_indices = @transform_0, window_bounds = array<i64: 8, 2, 96>}, {transform_indices = @transform_1, window_bounds = array<i64: 8, 2, 32>}, {pipeline_mode = #tpu.pipeline_mode<synchronous>, transform_indices = @transform_2, window_bounds = array<i64: 32, 128>}, {pipeline_mode = #tpu.pipeline_mode<synchronous>, transform_indices = @transform_3, window_bounds = array<i64: 32, 128>}, {pipeline_mode = #tpu.pipeline_mode<synchronous>, transform_indices = @transform_4, window_bounds = array<i64: 1, 32>}, {transform_indices = @transform_5, window_bounds = array<i64: 8, 2, 32>}]} {
    %c0_i32 = arith.constant 0 : i32
    %0 = arith.cmpi eq, %arg1, %c0_i32 : i32
    %1 = arith.extui %0 : i1 to i32
    %c0_i32_0 = arith.constant 0 : i32
    %2 = arith.cmpi ne, %1, %c0_i32_0 : i32
    scf.if %2 {
      %cst_86 = arith.constant 0.000000e+00 : f32
      %268 = vector.broadcast %cst_86 : f32 to vector<2x32xf32>
      %c0_87 = arith.constant 0 : index
      %c0_88 = arith.constant 0 : index
      %269 = vector.load %arg8[%c0_87, %c0_88] : memref<2x32xf32, #tpu.memory_space<vmem>>, vector<2x32xf32>
      tpu.vector_store %arg8[%c0_87, %c0_88], %268 {strides = array<i32>} : memref<2x32xf32, #tpu.memory_space<vmem>>, vector<2x32xf32>,
      %cst_89 = arith.constant 0.000000e+00 : f32
      %270 = vector.broadcast %cst_89 : f32 to vector<2x32xf32>
      %c0_90 = arith.constant 0 : index
      %c0_91 = arith.constant 0 : index
      %271 = vector.load %arg9[%c0_90, %c0_91] : memref<2x32xf32, #tpu.memory_space<vmem>>, vector<2x32xf32>
      tpu.vector_store %arg9[%c0_90, %c0_91], %270 {strides = array<i32>} : memref<2x32xf32, #tpu.memory_space<vmem>>, vector<2x32xf32>,
    } else {
    }
    %c0 = arith.constant 0 : index
    %c0_1 = arith.constant 0 : index
    %3 = vector.load %arg4[%c0, %c0_1] : memref<32x128xf32, #tpu.memory_space<vmem>>, vector<32x128xf32>
    %c0_2 = arith.constant 0 : index
    %c0_3 = arith.constant 0 : index
    %4 = vector.load %arg5[%c0_2, %c0_3] : memref<32x128xf32, #tpu.memory_space<vmem>>, vector<32x128xf32>
    %c0_4 = arith.constant 0 : index
    %c0_5 = arith.constant 0 : index
    %5 = vector.load %arg6[%c0_4, %c0_5] : memref<1x32xf32, #tpu.memory_space<vmem>>, vector<1x32xf32>
    %6 = vector.shape_cast %5 : vector<1x32xf32> to vector<1x32xf32>
    %7 = vector.broadcast %6 : vector<1x32xf32> to vector<2x32xf32>
    %c0_6 = arith.constant 0 : index
    %c0_7 = arith.constant 0 : index
    %8 = vector.load %arg8[%c0_6, %c0_7] : memref<2x32xf32, #tpu.memory_space<vmem>>, vector<2x32xf32>
    %c0_8 = arith.constant 0 : index
    %c0_9 = arith.constant 0 : index
    %9 = vector.load %arg9[%c0_8, %c0_9] : memref<2x32xf32, #tpu.memory_space<vmem>>, vector<2x32xf32>
    %c0_i32_10 = arith.constant 0 : i32
    %cst = arith.constant dense<0.000000e+00> : vector<2x128xf32>
    %10 = tpu.matmul %8, %3, %cst {dimension_numbers = #tpu.dot_dimension_numbers<[1], [0], [0], [1], [0, 0, 1, 1], [], []>} : vector<2x32xf32>, vector<32x128xf32>, vector<2x128xf32> -> vector<2x128xf32>
    %cst_11 = arith.constant dense<0.000000e+00> : vector<2x128xf32>
    %11 = tpu.matmul %9, %4, %cst_11 {dimension_numbers = #tpu.dot_dimension_numbers<[1], [0], [0], [1], [0, 0, 1, 1], [], []>} : vector<2x32xf32>, vector<32x128xf32>, vector<2x128xf32> -> vector<2x128xf32>
    %12 = arith.addf %10, %11 : vector<2x128xf32>
    %13 = arith.index_cast %c0_i32_10 : i32 to index
    %c0_12 = arith.constant 0 : index
    %c0_13 = arith.constant 0 : index
    %14 = vector.load %arg2[%13, %c0_12, %c0_13] : memref<8x2x96xf32, #tpu.memory_space<vmem>>, vector<1x2x96xf32>
    %15 = vector.shape_cast %14 : vector<1x2x96xf32> to vector<2x96xf32>
    %16 = vector.extract_strided_slice %12 {offsets = [0, 0], sizes = [2, 96], strides = [1, 1]} : vector<2x128xf32> to vector<2x96xf32>
    %17 = arith.addf %15, %16 : vector<2x96xf32>
    %18 = arith.negf %17 : vector<2x96xf32>
    %19 = math.exp %18 : vector<2x96xf32>
    %cst_14 = arith.constant 1.000000e+00 : f32
    %20 = vector.broadcast %cst_14 : f32 to vector<2x96xf32>
    %21 = arith.addf %20, %19 : vector<2x96xf32>
    %22 = arith.divf %20, %21 : vector<2x96xf32>
    %23 = vector.extract_strided_slice %22 {offsets = [0, 0], sizes = [2, 32], strides = [1, 1]} : vector<2x96xf32> to vector<2x32xf32>
    %24 = vector.extract_strided_slice %22 {offsets = [0, 32], sizes = [2, 32], strides = [1, 1]} : vector<2x96xf32> to vector<2x32xf32>
    %25 = vector.extract_strided_slice %22 {offsets = [0, 64], sizes = [2, 32], strides = [1, 1]} : vector<2x96xf32> to vector<2x32xf32>
    %26 = vector.extract_strided_slice %12 {offsets = [0, 96], sizes = [2, 32], strides = [1, 1]} : vector<2x128xf32> to vector<2x32xf32>
    %27 = arith.addf %26, %7 : vector<2x32xf32>
    %28 = math.tanh %27 : vector<2x32xf32>
    %29 = arith.mulf %24, %9 : vector<2x32xf32>
    %30 = arith.mulf %23, %28 : vector<2x32xf32>
    %31 = arith.addf %29, %30 : vector<2x32xf32>
    %32 = math.tanh %31 : vector<2x32xf32>
    %33 = arith.index_cast %c0_i32_10 : i32 to index
    %c0_15 = arith.constant 0 : index
    %c0_16 = arith.constant 0 : index
    %34 = vector.load %arg3[%33, %c0_15, %c0_16] : memref<8x2x32xf32, #tpu.memory_space<vmem>>, vector<1x2x32xf32>
    %35 = vector.shape_cast %34 : vector<1x2x32xf32> to vector<2x32xf32>
    %36 = arith.addf %32, %35 : vector<2x32xf32>
    %37 = arith.mulf %25, %36 : vector<2x32xf32>
    %38 = arith.index_cast %c0_i32_10 : i32 to index
    %c0_17 = arith.constant 0 : index
    %c0_18 = arith.constant 0 : index
    %39 = vector.load %arg7[%38, %c0_17, %c0_18] : memref<8x2x32xf32, #tpu.memory_space<vmem>>, vector<1x2x32xf32>
    %40 = vector.shape_cast %39 : vector<1x2x32xf32> to vector<2x32xf32>
    %41 = vector.shape_cast %37 : vector<2x32xf32> to vector<1x2x32xf32>
    tpu.vector_store %arg7[%38, %c0_17, %c0_18], %41 {strides = array<i32>} : memref<8x2x32xf32, #tpu.memory_space<vmem>>, vector<1x2x32xf32>,
    %c1_i32 = arith.constant 1 : i32
    %cst_19 = arith.constant dense<0.000000e+00> : vector<2x128xf32>
    %42 = tpu.matmul %37, %3, %cst_19 {dimension_numbers = #tpu.dot_dimension_numbers<[1], [0], [0], [1], [0, 0, 1, 1], [], []>} : vector<2x32xf32>, vector<32x128xf32>, vector<2x128xf32> -> vector<2x128xf32>
    %cst_20 = arith.constant dense<0.000000e+00> : vector<2x128xf32>
    %43 = tpu.matmul %31, %4, %cst_20 {dimension_numbers = #tpu.dot_dimension_numbers<[1], [0], [0], [1], [0, 0, 1, 1], [], []>} : vector<2x32xf32>, vector<32x128xf32>, vector<2x128xf32> -> vector<2x128xf32>
    %44 = arith.addf %42, %43 : vector<2x128xf32>
    %45 = arith.index_cast %c1_i32 : i32 to index
    %c0_21 = arith.constant 0 : index
    %c0_22 = arith.constant 0 : index
    %46 = vector.load %arg2[%45, %c0_21, %c0_22] : memref<8x2x96xf32, #tpu.memory_space<vmem>>, vector<1x2x96xf32>
    %47 = vector.shape_cast %46 : vector<1x2x96xf32> to vector<2x96xf32>
    %48 = vector.extract_strided_slice %44 {offsets = [0, 0], sizes = [2, 96], strides = [1, 1]} : vector<2x128xf32> to vector<2x96xf32>
    %49 = arith.addf %47, %48 : vector<2x96xf32>
    %50 = arith.negf %49 : vector<2x96xf32>
    %51 = math.exp %50 : vector<2x96xf32>
    %cst_23 = arith.constant 1.000000e+00 : f32
    %52 = vector.broadcast %cst_23 : f32 to vector<2x96xf32>
    %53 = arith.addf %52, %51 : vector<2x96xf32>
    %54 = arith.divf %52, %53 : vector<2x96xf32>
    %55 = vector.extract_strided_slice %54 {offsets = [0, 0], sizes = [2, 32], strides = [1, 1]} : vector<2x96xf32> to vector<2x32xf32>
    %56 = vector.extract_strided_slice %54 {offsets = [0, 32], sizes = [2, 32], strides = [1, 1]} : vector<2x96xf32> to vector<2x32xf32>
    %57 = vector.extract_strided_slice %54 {offsets = [0, 64], sizes = [2, 32], strides = [1, 1]} : vector<2x96xf32> to vector<2x32xf32>
    %58 = vector.extract_strided_slice %44 {offsets = [0, 96], sizes = [2, 32], strides = [1, 1]} : vector<2x128xf32> to vector<2x32xf32>
    %59 = arith.addf %58, %7 : vector<2x32xf32>
    %60 = math.tanh %59 : vector<2x32xf32>
    %61 = arith.mulf %56, %31 : vector<2x32xf32>
    %62 = arith.mulf %55, %60 : vector<2x32xf32>
    %63 = arith.addf %61, %62 : vector<2x32xf32>
    %64 = math.tanh %63 : vector<2x32xf32>
    %65 = arith.index_cast %c1_i32 : i32 to index
    %c0_24 = arith.constant 0 : index
    %c0_25 = arith.constant 0 : index
    %66 = vector.load %arg3[%65, %c0_24, %c0_25] : memref<8x2x32xf32, #tpu.memory_space<vmem>>, vector<1x2x32xf32>
    %67 = vector.shape_cast %66 : vector<1x2x32xf32> to vector<2x32xf32>
    %68 = arith.addf %64, %67 : vector<2x32xf32>
    %69 = arith.mulf %57, %68 : vector<2x32xf32>
    %70 = arith.index_cast %c1_i32 : i32 to index
    %c0_26 = arith.constant 0 : index
    %c0_27 = arith.constant 0 : index
    %71 = vector.load %arg7[%70, %c0_26, %c0_27] : memref<8x2x32xf32, #tpu.memory_space<vmem>>, vector<1x2x32xf32>
    %72 = vector.shape_cast %71 : vector<1x2x32xf32> to vector<2x32xf32>
    %73 = vector.shape_cast %69 : vector<2x32xf32> to vector<1x2x32xf32>
    tpu.vector_store %arg7[%70, %c0_26, %c0_27], %73 {strides = array<i32>} : memref<8x2x32xf32, #tpu.memory_space<vmem>>, vector<1x2x32xf32>,
    %c2_i32 = arith.constant 2 : i32
    %cst_28 = arith.constant dense<0.000000e+00> : vector<2x128xf32>
    %74 = tpu.matmul %69, %3, %cst_28 {dimension_numbers = #tpu.dot_dimension_numbers<[1], [0], [0], [1], [0, 0, 1, 1], [], []>} : vector<2x32xf32>, vector<32x128xf32>, vector<2x128xf32> -> vector<2x128xf32>
    %cst_29 = arith.constant dense<0.000000e+00> : vector<2x128xf32>
    %75 = tpu.matmul %63, %4, %cst_29 {dimension_numbers = #tpu.dot_dimension_numbers<[1], [0], [0], [1], [0, 0, 1, 1], [], []>} : vector<2x32xf32>, vector<32x128xf32>, vector<2x128xf32> -> vector<2x128xf32>
    %76 = arith.addf %74, %75 : vector<2x128xf32>
    %77 = arith.index_cast %c2_i32 : i32 to index
    %c0_30 = arith.constant 0 : index
    %c0_31 = arith.constant 0 : index
    %78 = vector.load %arg2[%77, %c0_30, %c0_31] : memref<8x2x96xf32, #tpu.memory_space<vmem>>, vector<1x2x96xf32>
    %79 = vector.shape_cast %78 : vector<1x2x96xf32> to vector<2x96xf32>
    %80 = vector.extract_strided_slice %76 {offsets = [0, 0], sizes = [2, 96], strides = [1, 1]} : vector<2x128xf32> to vector<2x96xf32>
    %81 = arith.addf %79, %80 : vector<2x96xf32>
    %82 = arith.negf %81 : vector<2x96xf32>
    %83 = math.exp %82 : vector<2x96xf32>
    %cst_32 = arith.constant 1.000000e+00 : f32
    %84 = vector.broadcast %cst_32 : f32 to vector<2x96xf32>
    %85 = arith.addf %84, %83 : vector<2x96xf32>
    %86 = arith.divf %84, %85 : vector<2x96xf32>
    %87 = vector.extract_strided_slice %86 {offsets = [0, 0], sizes = [2, 32], strides = [1, 1]} : vector<2x96xf32> to vector<2x32xf32>
    %88 = vector.extract_strided_slice %86 {offsets = [0, 32], sizes = [2, 32], strides = [1, 1]} : vector<2x96xf32> to vector<2x32xf32>
    %89 = vector.extract_strided_slice %86 {offsets = [0, 64], sizes = [2, 32], strides = [1, 1]} : vector<2x96xf32> to vector<2x32xf32>
    %90 = vector.extract_strided_slice %76 {offsets = [0, 96], sizes = [2, 32], strides = [1, 1]} : vector<2x128xf32> to vector<2x32xf32>
    %91 = arith.addf %90, %7 : vector<2x32xf32>
    %92 = math.tanh %91 : vector<2x32xf32>
    %93 = arith.mulf %88, %63 : vector<2x32xf32>
    %94 = arith.mulf %87, %92 : vector<2x32xf32>
    %95 = arith.addf %93, %94 : vector<2x32xf32>
    %96 = math.tanh %95 : vector<2x32xf32>
    %97 = arith.index_cast %c2_i32 : i32 to index
    %c0_33 = arith.constant 0 : index
    %c0_34 = arith.constant 0 : index
    %98 = vector.load %arg3[%97, %c0_33, %c0_34] : memref<8x2x32xf32, #tpu.memory_space<vmem>>, vector<1x2x32xf32>
    %99 = vector.shape_cast %98 : vector<1x2x32xf32> to vector<2x32xf32>
    %100 = arith.addf %96, %99 : vector<2x32xf32>
    %101 = arith.mulf %89, %100 : vector<2x32xf32>
    %102 = arith.index_cast %c2_i32 : i32 to index
    %c0_35 = arith.constant 0 : index
    %c0_36 = arith.constant 0 : index
    %103 = vector.load %arg7[%102, %c0_35, %c0_36] : memref<8x2x32xf32, #tpu.memory_space<vmem>>, vector<1x2x32xf32>
    %104 = vector.shape_cast %103 : vector<1x2x32xf32> to vector<2x32xf32>
    %105 = vector.shape_cast %101 : vector<2x32xf32> to vector<1x2x32xf32>
    tpu.vector_store %arg7[%102, %c0_35, %c0_36], %105 {strides = array<i32>} : memref<8x2x32xf32, #tpu.memory_space<vmem>>, vector<1x2x32xf32>,
    %c3_i32 = arith.constant 3 : i32
    %cst_37 = arith.constant dense<0.000000e+00> : vector<2x128xf32>
    %106 = tpu.matmul %101, %3, %cst_37 {dimension_numbers = #tpu.dot_dimension_numbers<[1], [0], [0], [1], [0, 0, 1, 1], [], []>} : vector<2x32xf32>, vector<32x128xf32>, vector<2x128xf32> -> vector<2x128xf32>
    %cst_38 = arith.constant dense<0.000000e+00> : vector<2x128xf32>
    %107 = tpu.matmul %95, %4, %cst_38 {dimension_numbers = #tpu.dot_dimension_numbers<[1], [0], [0], [1], [0, 0, 1, 1], [], []>} : vector<2x32xf32>, vector<32x128xf32>, vector<2x128xf32> -> vector<2x128xf32>
    %108 = arith.addf %106, %107 : vector<2x128xf32>
    %109 = arith.index_cast %c3_i32 : i32 to index
    %c0_39 = arith.constant 0 : index
    %c0_40 = arith.constant 0 : index
    %110 = vector.load %arg2[%109, %c0_39, %c0_40] : memref<8x2x96xf32, #tpu.memory_space<vmem>>, vector<1x2x96xf32>
    %111 = vector.shape_cast %110 : vector<1x2x96xf32> to vector<2x96xf32>
    %112 = vector.extract_strided_slice %108 {offsets = [0, 0], sizes = [2, 96], strides = [1, 1]} : vector<2x128xf32> to vector<2x96xf32>
    %113 = arith.addf %111, %112 : vector<2x96xf32>
    %114 = arith.negf %113 : vector<2x96xf32>
    %115 = math.exp %114 : vector<2x96xf32>
    %cst_41 = arith.constant 1.000000e+00 : f32
    %116 = vector.broadcast %cst_41 : f32 to vector<2x96xf32>
    %117 = arith.addf %116, %115 : vector<2x96xf32>
    %118 = arith.divf %116, %117 : vector<2x96xf32>
    %119 = vector.extract_strided_slice %118 {offsets = [0, 0], sizes = [2, 32], strides = [1, 1]} : vector<2x96xf32> to vector<2x32xf32>
    %120 = vector.extract_strided_slice %118 {offsets = [0, 32], sizes = [2, 32], strides = [1, 1]} : vector<2x96xf32> to vector<2x32xf32>
    %121 = vector.extract_strided_slice %118 {offsets = [0, 64], sizes = [2, 32], strides = [1, 1]} : vector<2x96xf32> to vector<2x32xf32>
    %122 = vector.extract_strided_slice %108 {offsets = [0, 96], sizes = [2, 32], strides = [1, 1]} : vector<2x128xf32> to vector<2x32xf32>
    %123 = arith.addf %122, %7 : vector<2x32xf32>
    %124 = math.tanh %123 : vector<2x32xf32>
    %125 = arith.mulf %120, %95 : vector<2x32xf32>
    %126 = arith.mulf %119, %124 : vector<2x32xf32>
    %127 = arith.addf %125, %126 : vector<2x32xf32>
    %128 = math.tanh %127 : vector<2x32xf32>
    %129 = arith.index_cast %c3_i32 : i32 to index
    %c0_42 = arith.constant 0 : index
    %c0_43 = arith.constant 0 : index
    %130 = vector.load %arg3[%129, %c0_42, %c0_43] : memref<8x2x32xf32, #tpu.memory_space<vmem>>, vector<1x2x32xf32>
    %131 = vector.shape_cast %130 : vector<1x2x32xf32> to vector<2x32xf32>
    %132 = arith.addf %128, %131 : vector<2x32xf32>
    %133 = arith.mulf %121, %132 : vector<2x32xf32>
    %134 = arith.index_cast %c3_i32 : i32 to index
    %c0_44 = arith.constant 0 : index
    %c0_45 = arith.constant 0 : index
    %135 = vector.load %arg7[%134, %c0_44, %c0_45] : memref<8x2x32xf32, #tpu.memory_space<vmem>>, vector<1x2x32xf32>
    %136 = vector.shape_cast %135 : vector<1x2x32xf32> to vector<2x32xf32>
    %137 = vector.shape_cast %133 : vector<2x32xf32> to vector<1x2x32xf32>
    tpu.vector_store %arg7[%134, %c0_44, %c0_45], %137 {strides = array<i32>} : memref<8x2x32xf32, #tpu.memory_space<vmem>>, vector<1x2x32xf32>,
    %c4_i32 = arith.constant 4 : i32
    %cst_46 = arith.constant dense<0.000000e+00> : vector<2x128xf32>
    %138 = tpu.matmul %133, %3, %cst_46 {dimension_numbers = #tpu.dot_dimension_numbers<[1], [0], [0], [1], [0, 0, 1, 1], [], []>} : vector<2x32xf32>, vector<32x128xf32>, vector<2x128xf32> -> vector<2x128xf32>
    %cst_47 = arith.constant dense<0.000000e+00> : vector<2x128xf32>
    %139 = tpu.matmul %127, %4, %cst_47 {dimension_numbers = #tpu.dot_dimension_numbers<[1], [0], [0], [1], [0, 0, 1, 1], [], []>} : vector<2x32xf32>, vector<32x128xf32>, vector<2x128xf32> -> vector<2x128xf32>
    %140 = arith.addf %138, %139 : vector<2x128xf32>
    %141 = arith.index_cast %c4_i32 : i32 to index
    %c0_48 = arith.constant 0 : index
    %c0_49 = arith.constant 0 : index
    %142 = vector.load %arg2[%141, %c0_48, %c0_49] : memref<8x2x96xf32, #tpu.memory_space<vmem>>, vector<1x2x96xf32>
    %143 = vector.shape_cast %142 : vector<1x2x96xf32> to vector<2x96xf32>
    %144 = vector.extract_strided_slice %140 {offsets = [0, 0], sizes = [2, 96], strides = [1, 1]} : vector<2x128xf32> to vector<2x96xf32>
    %145 = arith.addf %143, %144 : vector<2x96xf32>
    %146 = arith.negf %145 : vector<2x96xf32>
    %147 = math.exp %146 : vector<2x96xf32>
    %cst_50 = arith.constant 1.000000e+00 : f32
    %148 = vector.broadcast %cst_50 : f32 to vector<2x96xf32>
    %149 = arith.addf %148, %147 : vector<2x96xf32>
    %150 = arith.divf %148, %149 : vector<2x96xf32>
    %151 = vector.extract_strided_slice %150 {offsets = [0, 0], sizes = [2, 32], strides = [1, 1]} : vector<2x96xf32> to vector<2x32xf32>
    %152 = vector.extract_strided_slice %150 {offsets = [0, 32], sizes = [2, 32], strides = [1, 1]} : vector<2x96xf32> to vector<2x32xf32>
    %153 = vector.extract_strided_slice %150 {offsets = [0, 64], sizes = [2, 32], strides = [1, 1]} : vector<2x96xf32> to vector<2x32xf32>
    %154 = vector.extract_strided_slice %140 {offsets = [0, 96], sizes = [2, 32], strides = [1, 1]} : vector<2x128xf32> to vector<2x32xf32>
    %155 = arith.addf %154, %7 : vector<2x32xf32>
    %156 = math.tanh %155 : vector<2x32xf32>
    %157 = arith.mulf %152, %127 : vector<2x32xf32>
    %158 = arith.mulf %151, %156 : vector<2x32xf32>
    %159 = arith.addf %157, %158 : vector<2x32xf32>
    %160 = math.tanh %159 : vector<2x32xf32>
    %161 = arith.index_cast %c4_i32 : i32 to index
    %c0_51 = arith.constant 0 : index
    %c0_52 = arith.constant 0 : index
    %162 = vector.load %arg3[%161, %c0_51, %c0_52] : memref<8x2x32xf32, #tpu.memory_space<vmem>>, vector<1x2x32xf32>
    %163 = vector.shape_cast %162 : vector<1x2x32xf32> to vector<2x32xf32>
    %164 = arith.addf %160, %163 : vector<2x32xf32>
    %165 = arith.mulf %153, %164 : vector<2x32xf32>
    %166 = arith.index_cast %c4_i32 : i32 to index
    %c0_53 = arith.constant 0 : index
    %c0_54 = arith.constant 0 : index
    %167 = vector.load %arg7[%166, %c0_53, %c0_54] : memref<8x2x32xf32, #tpu.memory_space<vmem>>, vector<1x2x32xf32>
    %168 = vector.shape_cast %167 : vector<1x2x32xf32> to vector<2x32xf32>
    %169 = vector.shape_cast %165 : vector<2x32xf32> to vector<1x2x32xf32>
    tpu.vector_store %arg7[%166, %c0_53, %c0_54], %169 {strides = array<i32>} : memref<8x2x32xf32, #tpu.memory_space<vmem>>, vector<1x2x32xf32>,
    %c5_i32 = arith.constant 5 : i32
    %cst_55 = arith.constant dense<0.000000e+00> : vector<2x128xf32>
    %170 = tpu.matmul %165, %3, %cst_55 {dimension_numbers = #tpu.dot_dimension_numbers<[1], [0], [0], [1], [0, 0, 1, 1], [], []>} : vector<2x32xf32>, vector<32x128xf32>, vector<2x128xf32> -> vector<2x128xf32>
    %cst_56 = arith.constant dense<0.000000e+00> : vector<2x128xf32>
    %171 = tpu.matmul %159, %4, %cst_56 {dimension_numbers = #tpu.dot_dimension_numbers<[1], [0], [0], [1], [0, 0, 1, 1], [], []>} : vector<2x32xf32>, vector<32x128xf32>, vector<2x128xf32> -> vector<2x128xf32>
    %172 = arith.addf %170, %171 : vector<2x128xf32>
    %173 = arith.index_cast %c5_i32 : i32 to index
    %c0_57 = arith.constant 0 : index
    %c0_58 = arith.constant 0 : index
    %174 = vector.load %arg2[%173, %c0_57, %c0_58] : memref<8x2x96xf32, #tpu.memory_space<vmem>>, vector<1x2x96xf32>
    %175 = vector.shape_cast %174 : vector<1x2x96xf32> to vector<2x96xf32>
    %176 = vector.extract_strided_slice %172 {offsets = [0, 0], sizes = [2, 96], strides = [1, 1]} : vector<2x128xf32> to vector<2x96xf32>
    %177 = arith.addf %175, %176 : vector<2x96xf32>
    %178 = arith.negf %177 : vector<2x96xf32>
    %179 = math.exp %178 : vector<2x96xf32>
    %cst_59 = arith.constant 1.000000e+00 : f32
    %180 = vector.broadcast %cst_59 : f32 to vector<2x96xf32>
    %181 = arith.addf %180, %179 : vector<2x96xf32>
    %182 = arith.divf %180, %181 : vector<2x96xf32>
    %183 = vector.extract_strided_slice %182 {offsets = [0, 0], sizes = [2, 32], strides = [1, 1]} : vector<2x96xf32> to vector<2x32xf32>
    %184 = vector.extract_strided_slice %182 {offsets = [0, 32], sizes = [2, 32], strides = [1, 1]} : vector<2x96xf32> to vector<2x32xf32>
    %185 = vector.extract_strided_slice %182 {offsets = [0, 64], sizes = [2, 32], strides = [1, 1]} : vector<2x96xf32> to vector<2x32xf32>
    %186 = vector.extract_strided_slice %172 {offsets = [0, 96], sizes = [2, 32], strides = [1, 1]} : vector<2x128xf32> to vector<2x32xf32>
    %187 = arith.addf %186, %7 : vector<2x32xf32>
    %188 = math.tanh %187 : vector<2x32xf32>
    %189 = arith.mulf %184, %159 : vector<2x32xf32>
    %190 = arith.mulf %183, %188 : vector<2x32xf32>
    %191 = arith.addf %189, %190 : vector<2x32xf32>
    %192 = math.tanh %191 : vector<2x32xf32>
    %193 = arith.index_cast %c5_i32 : i32 to index
    %c0_60 = arith.constant 0 : index
    %c0_61 = arith.constant 0 : index
    %194 = vector.load %arg3[%193, %c0_60, %c0_61] : memref<8x2x32xf32, #tpu.memory_space<vmem>>, vector<1x2x32xf32>
    %195 = vector.shape_cast %194 : vector<1x2x32xf32> to vector<2x32xf32>
    %196 = arith.addf %192, %195 : vector<2x32xf32>
    %197 = arith.mulf %185, %196 : vector<2x32xf32>
    %198 = arith.index_cast %c5_i32 : i32 to index
    %c0_62 = arith.constant 0 : index
    %c0_63 = arith.constant 0 : index
    %199 = vector.load %arg7[%198, %c0_62, %c0_63] : memref<8x2x32xf32, #tpu.memory_space<vmem>>, vector<1x2x32xf32>
    %200 = vector.shape_cast %199 : vector<1x2x32xf32> to vector<2x32xf32>
    %201 = vector.shape_cast %197 : vector<2x32xf32> to vector<1x2x32xf32>
    tpu.vector_store %arg7[%198, %c0_62, %c0_63], %201 {strides = array<i32>} : memref<8x2x32xf32, #tpu.memory_space<vmem>>, vector<1x2x32xf32>,
    %c6_i32 = arith.constant 6 : i32
    %cst_64 = arith.constant dense<0.000000e+00> : vector<2x128xf32>
    %202 = tpu.matmul %197, %3, %cst_64 {dimension_numbers = #tpu.dot_dimension_numbers<[1], [0], [0], [1], [0, 0, 1, 1], [], []>} : vector<2x32xf32>, vector<32x128xf32>, vector<2x128xf32> -> vector<2x128xf32>
    %cst_65 = arith.constant dense<0.000000e+00> : vector<2x128xf32>
    %203 = tpu.matmul %191, %4, %cst_65 {dimension_numbers = #tpu.dot_dimension_numbers<[1], [0], [0], [1], [0, 0, 1, 1], [], []>} : vector<2x32xf32>, vector<32x128xf32>, vector<2x128xf32> -> vector<2x128xf32>
    %204 = arith.addf %202, %203 : vector<2x128xf32>
    %205 = arith.index_cast %c6_i32 : i32 to index
    %c0_66 = arith.constant 0 : index
    %c0_67 = arith.constant 0 : index
    %206 = vector.load %arg2[%205, %c0_66, %c0_67] : memref<8x2x96xf32, #tpu.memory_space<vmem>>, vector<1x2x96xf32>
    %207 = vector.shape_cast %206 : vector<1x2x96xf32> to vector<2x96xf32>
    %208 = vector.extract_strided_slice %204 {offsets = [0, 0], sizes = [2, 96], strides = [1, 1]} : vector<2x128xf32> to vector<2x96xf32>
    %209 = arith.addf %207, %208 : vector<2x96xf32>
    %210 = arith.negf %209 : vector<2x96xf32>
    %211 = math.exp %210 : vector<2x96xf32>
    %cst_68 = arith.constant 1.000000e+00 : f32
    %212 = vector.broadcast %cst_68 : f32 to vector<2x96xf32>
    %213 = arith.addf %212, %211 : vector<2x96xf32>
    %214 = arith.divf %212, %213 : vector<2x96xf32>
    %215 = vector.extract_strided_slice %214 {offsets = [0, 0], sizes = [2, 32], strides = [1, 1]} : vector<2x96xf32> to vector<2x32xf32>
    %216 = vector.extract_strided_slice %214 {offsets = [0, 32], sizes = [2, 32], strides = [1, 1]} : vector<2x96xf32> to vector<2x32xf32>
    %217 = vector.extract_strided_slice %214 {offsets = [0, 64], sizes = [2, 32], strides = [1, 1]} : vector<2x96xf32> to vector<2x32xf32>
    %218 = vector.extract_strided_slice %204 {offsets = [0, 96], sizes = [2, 32], strides = [1, 1]} : vector<2x128xf32> to vector<2x32xf32>
    %219 = arith.addf %218, %7 : vector<2x32xf32>
    %220 = math.tanh %219 : vector<2x32xf32>
    %221 = arith.mulf %216, %191 : vector<2x32xf32>
    %222 = arith.mulf %215, %220 : vector<2x32xf32>
    %223 = arith.addf %221, %222 : vector<2x32xf32>
    %224 = math.tanh %223 : vector<2x32xf32>
    %225 = arith.index_cast %c6_i32 : i32 to index
    %c0_69 = arith.constant 0 : index
    %c0_70 = arith.constant 0 : index
    %226 = vector.load %arg3[%225, %c0_69, %c0_70] : memref<8x2x32xf32, #tpu.memory_space<vmem>>, vector<1x2x32xf32>
    %227 = vector.shape_cast %226 : vector<1x2x32xf32> to vector<2x32xf32>
    %228 = arith.addf %224, %227 : vector<2x32xf32>
    %229 = arith.mulf %217, %228 : vector<2x32xf32>
    %230 = arith.index_cast %c6_i32 : i32 to index
    %c0_71 = arith.constant 0 : index
    %c0_72 = arith.constant 0 : index
    %231 = vector.load %arg7[%230, %c0_71, %c0_72] : memref<8x2x32xf32, #tpu.memory_space<vmem>>, vector<1x2x32xf32>
    %232 = vector.shape_cast %231 : vector<1x2x32xf32> to vector<2x32xf32>
    %233 = vector.shape_cast %229 : vector<2x32xf32> to vector<1x2x32xf32>
    tpu.vector_store %arg7[%230, %c0_71, %c0_72], %233 {strides = array<i32>} : memref<8x2x32xf32, #tpu.memory_space<vmem>>, vector<1x2x32xf32>,
    %c7_i32 = arith.constant 7 : i32
    %cst_73 = arith.constant dense<0.000000e+00> : vector<2x128xf32>
    %234 = tpu.matmul %229, %3, %cst_73 {dimension_numbers = #tpu.dot_dimension_numbers<[1], [0], [0], [1], [0, 0, 1, 1], [], []>} : vector<2x32xf32>, vector<32x128xf32>, vector<2x128xf32> -> vector<2x128xf32>
    %cst_74 = arith.constant dense<0.000000e+00> : vector<2x128xf32>
    %235 = tpu.matmul %223, %4, %cst_74 {dimension_numbers = #tpu.dot_dimension_numbers<[1], [0], [0], [1], [0, 0, 1, 1], [], []>} : vector<2x32xf32>, vector<32x128xf32>, vector<2x128xf32> -> vector<2x128xf32>
    %236 = arith.addf %234, %235 : vector<2x128xf32>
    %237 = arith.index_cast %c7_i32 : i32 to index
    %c0_75 = arith.constant 0 : index
    %c0_76 = arith.constant 0 : index
    %238 = vector.load %arg2[%237, %c0_75, %c0_76] : memref<8x2x96xf32, #tpu.memory_space<vmem>>, vector<1x2x96xf32>
    %239 = vector.shape_cast %238 : vector<1x2x96xf32> to vector<2x96xf32>
    %240 = vector.extract_strided_slice %236 {offsets = [0, 0], sizes = [2, 96], strides = [1, 1]} : vector<2x128xf32> to vector<2x96xf32>
    %241 = arith.addf %239, %240 : vector<2x96xf32>
    %242 = arith.negf %241 : vector<2x96xf32>
    %243 = math.exp %242 : vector<2x96xf32>
    %cst_77 = arith.constant 1.000000e+00 : f32
    %244 = vector.broadcast %cst_77 : f32 to vector<2x96xf32>
    %245 = arith.addf %244, %243 : vector<2x96xf32>
    %246 = arith.divf %244, %245 : vector<2x96xf32>
    %247 = vector.extract_strided_slice %246 {offsets = [0, 0], sizes = [2, 32], strides = [1, 1]} : vector<2x96xf32> to vector<2x32xf32>
    %248 = vector.extract_strided_slice %246 {offsets = [0, 32], sizes = [2, 32], strides = [1, 1]} : vector<2x96xf32> to vector<2x32xf32>
    %249 = vector.extract_strided_slice %246 {offsets = [0, 64], sizes = [2, 32], strides = [1, 1]} : vector<2x96xf32> to vector<2x32xf32>
    %250 = vector.extract_strided_slice %236 {offsets = [0, 96], sizes = [2, 32], strides = [1, 1]} : vector<2x128xf32> to vector<2x32xf32>
    %251 = arith.addf %250, %7 : vector<2x32xf32>
    %252 = math.tanh %251 : vector<2x32xf32>
    %253 = arith.mulf %248, %223 : vector<2x32xf32>
    %254 = arith.mulf %247, %252 : vector<2x32xf32>
    %255 = arith.addf %253, %254 : vector<2x32xf32>
    %256 = math.tanh %255 : vector<2x32xf32>
    %257 = arith.index_cast %c7_i32 : i32 to index
    %c0_78 = arith.constant 0 : index
    %c0_79 = arith.constant 0 : index
    %258 = vector.load %arg3[%257, %c0_78, %c0_79] : memref<8x2x32xf32, #tpu.memory_space<vmem>>, vector<1x2x32xf32>
    %259 = vector.shape_cast %258 : vector<1x2x32xf32> to vector<2x32xf32>
    %260 = arith.addf %256, %259 : vector<2x32xf32>
    %261 = arith.mulf %249, %260 : vector<2x32xf32>
    %262 = arith.index_cast %c7_i32 : i32 to index
    %c0_80 = arith.constant 0 : index
    %c0_81 = arith.constant 0 : index
    %263 = vector.load %arg7[%262, %c0_80, %c0_81] : memref<8x2x32xf32, #tpu.memory_space<vmem>>, vector<1x2x32xf32>
    %264 = vector.shape_cast %263 : vector<1x2x32xf32> to vector<2x32xf32>
    %265 = vector.shape_cast %261 : vector<2x32xf32> to vector<1x2x32xf32>
    tpu.vector_store %arg7[%262, %c0_80, %c0_81], %265 {strides = array<i32>} : memref<8x2x32xf32, #tpu.memory_space<vmem>>, vector<1x2x32xf32>,
    %c8_i32 = arith.constant 8 : i32
    %c0_82 = arith.constant 0 : index
    %c0_83 = arith.constant 0 : index
    %266 = vector.load %arg8[%c0_82, %c0_83] : memref<2x32xf32, #tpu.memory_space<vmem>>, vector<2x32xf32>
    tpu.vector_store %arg8[%c0_82, %c0_83], %261 {strides = array<i32>} : memref<2x32xf32, #tpu.memory_space<vmem>>, vector<2x32xf32>,
    %c0_84 = arith.constant 0 : index
    %c0_85 = arith.constant 0 : index
    %267 = vector.load %arg9[%c0_84, %c0_85] : memref<2x32xf32, #tpu.memory_space<vmem>>, vector<2x32xf32>
    tpu.vector_store %arg9[%c0_84, %c0_85], %255 {strides = array<i32>} : memref<2x32xf32, #tpu.memory_space<vmem>>, vector<2x32xf32>,
    return
  }
  func.func @transform_0(%arg0: i32, %arg1: i32) -> (i32, i32, i32) {
    %c0_i32 = arith.constant 0 : i32
    %c0_i32_0 = arith.constant 0 : i32
    return %arg1, %arg0, %c0_i32 : i32, i32, i32
  }
  func.func @transform_1(%arg0: i32, %arg1: i32) -> (i32, i32, i32) {
    %c0_i32 = arith.constant 0 : i32
    %c0_i32_0 = arith.constant 0 : i32
    return %arg1, %arg0, %c0_i32 : i32, i32, i32
  }
  func.func @transform_2(%arg0: i32, %arg1: i32) -> (i32, i32) {
    %c0_i32 = arith.constant 0 : i32
    %c0_i32_0 = arith.constant 0 : i32
    %c0_i32_1 = arith.constant 0 : i32
    return %c0_i32, %c0_i32_0 : i32, i32
  }
  func.func @transform_3(%arg0: i32, %arg1: i32) -> (i32, i32) {
    %c0_i32 = arith.constant 0 : i32
    %c0_i32_0 = arith.constant 0 : i32
    %c0_i32_1 = arith.constant 0 : i32
    return %c0_i32, %c0_i32_0 : i32, i32
  }
  func.func @transform_4(%arg0: i32, %arg1: i32) -> (i32, i32) {
    %c0_i32 = arith.constant 0 : i32
    %c0_i32_0 = arith.constant 0 : i32
    %c0_i32_1 = arith.constant 0 : i32
    return %c0_i32, %c0_i32_0 : i32, i32
  }
  func.func @transform_5(%arg0: i32, %arg1: i32) -> (i32, i32, i32) {
    %c0_i32 = arith.constant 0 : i32
    %c0_i32_0 = arith.constant 0 : i32
    return %arg1, %arg0, %c0_i32 : i32, i32, i32
  }
}

</mosaic_0001>

<bundles_post_ra>
// kernel: tpu_custom_call.1
= control target key start
LH: loop header
LB: loop body
LE: loop exit
PB: predicated region body
PF: predicated region fallthrough
CT: control target
= control target key end

     0   :  { %10 = vsyncpa [#allocation5], 0  ;;  %s2434_s0 = inlined_call_operand.hbm [shape: f32[8,2,96], index: 0, kind: input, shape index: {}]   ;;  %s2435_s1 = inlined_call_operand.hbm [shape: f32[8,2,32], index: 1, kind: input, shape index: {}]   ;;  %s2436_s2 = inlined_call_operand.hbm [shape: f32[32,128], index: 2, kind: input, shape index: {}]   ;;  %s2437_s3 = inlined_call_operand.hbm [shape: f32[32,128], index: 3, kind: input, shape index: {}]   ;;  %s2438_s4 = inlined_call_operand.vmem [shape: f32[1,32], index: 4, kind: input, shape index: {}]   ;;  %s2439_s5 = inlined_call_operand.hbm [shape: f32[8,2,32], index: 5, kind: output, shape index: {}]  }
   0x1   :  { %11 = vsyncpa [#allocation8], 0 }
   0x2   :  { %12 = vsyncpa [#allocation11], 0 }
   0x3   :  { %13 = vsyncpa [#allocation6], 0  ;;  %s2098_s18 = smov [#allocation7]   ;;  %s2099_s20 = smov [#allocation4]  }
   0x4   :  { %s31_s19 = sshll.u32 %s2098_s18, 4  ;;  %s19_s21 = sshll.u32 %s2099_s20, 4  ;;  %s32_s19 = int_to_ptr.vmem [resolvable:$true] %s31_s19  ;;  %s20_s21 = int_to_ptr.vmem [resolvable:$true] %s19_s21 }
   0x5   :  { %s1998_s22 = scalar_lea.vmem %s32_s19, 256  ;;  %p2003_p1 = scmp.lt.s32.totalorder %s32_s19, %s32_s19 }
   0x6   :  { %p1999_p0 = scmp.ne.s32.totalorder %s32_s19, %s1998_s22  ;;  %p2004_p2 = scmp.lt.s32.totalorder %s1998_s22, %s1998_s22 }
   0x8   :  { %p2005_p3 = por %p2004_p2, %p2003_p1 }
   0xa   :  { %p2006_p4 = pnand %p2005_p3, %p1999_p0 }
   0xc   :  { %2009 = shalt.err (!%p2006_p4)
}
   0xd   :  { %s2100_s23 = smov 32   ;;  %s2101_s24 = smov 2  }
   0xe   :  { %37 = dma.hbm_to_vmem [thread:$0]  %s2435_s1, 256, %s32_s19, [#allocation8], %s2100_s23, %s2100_s23, %s2101_s24  }
   0xf   :  { %s2018_s27 = scalar_lea.vmem %s20_s21, 256  ;;  %p2023_p6 = scmp.lt.s32.totalorder %s20_s21, %s20_s21 }
  0x10   :  { %p2019_p5 = scmp.ne.s32.totalorder %s20_s21, %s2018_s27  ;;  %p2024_p7 = scmp.lt.s32.totalorder %s2018_s27, %s2018_s27 }
  0x12   :  { %p2025_p8 = por %p2024_p7, %p2023_p6 }
  0x14   :  { %p2026_p9 = pnand %p2025_p8, %p2019_p5 }
  0x16   :  { %2029 = shalt.err (!%p2026_p9)
}
  0x17   :  { %25 = dma.hbm_to_vmem [thread:$0]  %s2434_s0, 256, %s20_s21, [#allocation5], %s2100_s23, %s2100_s23, %s2101_s24  }
  0x18   :  { %s2102_s30 = smov [#allocation9]  }
  0x19   :  { %s43_s6 = sshll.u32 %s2102_s30, 4  ;;  %s44_s6 = int_to_ptr.vmem [resolvable:$true] %s43_s6 }
  0x1a   :  { %s2038_s7 = scalar_lea.vmem %s44_s6, 512  ;;  %p2043_p11 = scmp.lt.s32.totalorder %s44_s6, %s44_s6 }
  0x1b   :  { %p2039_p10 = scmp.ne.s32.totalorder %s44_s6, %s2038_s7  ;;  %p2044_p12 = scmp.lt.s32.totalorder %s2038_s7, %s2038_s7 }
  0x1d   :  { %p2045_p13 = por %p2044_p12, %p2043_p11 }
  0x1f   :  { %p2046_p0 = pnand %p2045_p13, %p2039_p10 }
  0x21   :  { %2049 = shalt.err (!%p2046_p0)
}
  0x22   :  { %s2103_s1 = smov 128   ;;  %s2104_s8 = smov 8  }
  0x23   :  { %49 = dma.hbm_to_vmem [thread:$0]  %s2436_s2, 512, %s44_s6, [#allocation8], %s2103_s1, %s2103_s1, %s2104_s8  }
  0x24   :  { %s2105_s11 = smov [#allocation10]  }
  0x25   :  { %s55_s12 = sshll.u32 %s2105_s11, 4  ;;  %s56_s12 = int_to_ptr.vmem [resolvable:$true] %s55_s12 }
  0x26   :  { %s2058_s0 = scalar_lea.vmem %s56_s12, 512  ;;  %p2063_p2 = scmp.lt.s32.totalorder %s56_s12, %s56_s12 }
  0x27   :  { %p2059_p1 = scmp.ne.s32.totalorder %s56_s12, %s2058_s0  ;;  %p2064_p3 = scmp.lt.s32.totalorder %s2058_s0, %s2058_s0 }
  0x29   :  { %p2065_p4 = por %p2064_p3, %p2063_p2 }
  0x2b   :  { %p2066_p5 = pnand %p2065_p4, %p2059_p1 }
  0x2d   :  { %2069 = shalt.err (!%p2066_p5)
}
  0x2e   :  { %61 = dma.hbm_to_vmem [thread:$0]  %s2437_s3, 512, %s56_s12, [#allocation11], %s2103_s1, %s2103_s1, %s2104_s8  }
  0x2f   :  { %2090 = dma.done.wait [#allocation5], 256  }
  0x30   :  { %2091 = vsyncadd [#allocation5], 4294967040 }
  0x31   :  { %2092 = dma.done.wait [#allocation8], 768  }
  0x32   :  { %2093 = vsyncadd [#allocation8], 4294966528 }
  0x33   :  { %2094 = dma.done.wait [#allocation11], 512  }
  0x34   :  { %2095 = vsyncadd [#allocation11], 4294966784  ;;  %vm80_vm0 = vcmask 254976   ;;  %v2106_v0 = vmov 0.0   ;;  %vm2107_vm1 = vmmov 0   ;;  %v2169_v1 = vld [vmem:[#allocation10 + $0x18] sm:$0xff] }
  0x35   :  { %1737 = vmatprep.subr.mxu0 %v2106_v0  ;;  %1748 = vmatprep.subr.mxu1 %v2106_v0  ;;  %82 = vst.msk [vmem:[#allocation3] sm:$0x3] %vm80_vm0, %v2106_v0  ;;  %81 = vst.msk [vmem:[#allocation2] sm:$0x3] %vm80_vm0, %v2106_v0  ;;  %v2171_v2 = vld [vmem:[#allocation9 + $0x18] sm:$0xff]  ;;  %v2173_v3 = vld [vmem:[#allocation10 + $0x10] sm:$0xff] }
  0x36   :  { %1745 = vmatprep.mubr.msk.f32.mxu0 %vm2107_vm1, %v2106_v0  ;;  %1756 = vmatprep.mubr.msk.f32.mxu1 %vm2107_vm1, %v2106_v0  ;;  %v2177_v4 = vld [vmem:[#allocation9 + $0x10] sm:$0xff]  ;;  %v2181_v5 = vld [vmem:[#allocation10 + $0x8] sm:$0xff]  ;;  %v2189_v7 = vld [vmem:[#allocation10] sm:$0xff]  ;;  %vm99_vm2 = vcmask 261120   ;;  %s2108_s15 = smov 96   ;;  %s2110_s16 = smov [#allocation12]  }
  0x37   :  { %1738 = vmatpush3.msra.mxu0 %v2169_v1  ;;  %1749 = vmatpush3.msra.mxu1 %v2171_v2  ;;  %v2183_v6 = vld [vmem:[#allocation9 + $0x8] sm:$0xff]  ;;  %v2191_v8 = vld [vmem:[#allocation9] sm:$0xff]  ;;  %v1632_v11 = vld [vmem:[%s2438_s4] ss:$0 sm:$0xff]  ;;  %s2109_s4 = smov 64   ;;  %s1618_s17 = sshll.u32 %s2110_s16, 4  ;;  %s1619_s17 = int_to_ptr.vmem [resolvable:$true] %s1618_s17 }
  0x38   :  { %1739 = vmatprep.subr.mxu0 %v2106_v0  ;;  %1750 = vmatprep.subr.mxu1 %v2106_v0  ;;  %v274_v20 = vld [vmem:[#allocation7] sm:$0x3]  ;;  %v246_v21 = vld [vmem:[#allocation4] sm:$0x3]  ;;  %v462_v47 = vld [vmem:[#allocation7 + $0x2] sm:$0x3]  ;;  %p2075_p7 = scmp.lt.s32.totalorder %s1619_s17, %s1619_s17 }
  0x39   :  { %1740 = vmatpush3.msra.mxu0 %v2173_v3  ;;  %1751 = vmatpush3.msra.mxu1 %v2177_v4  ;;  %v439_v48 = vld [vmem:[#allocation4 + $0x2] sm:$0x3]  ;;  %s2070_s18 = scalar_lea.vmem %s1619_s17, 256 }
  0x3a   :  { %1741 = vmatprep.subr.mxu0 %v2106_v0  ;;  %1752 = vmatprep.subr.mxu1 %v2106_v0  ;;  %p2071_p6 = scmp.ne.s32.totalorder %s1619_s17, %s2070_s18  ;;  %p2076_p8 = scmp.lt.s32.totalorder %s2070_s18, %s2070_s18 }
  0x3b   :  { %1742 = vmatpush3.msra.mxu0 %v2181_v5  ;;  %1753 = vmatpush3.msra.mxu1 %v2183_v6 }
  0x3c   :  { %v98_v9 = vld [vmem:[#allocation3] sm:$0x3]  ;;  %v97_v10 = vld [vmem:[#allocation2] sm:$0x3]  ;;  %1743 = vmatprep.subr.mxu0 %v2106_v0  ;;  %1754 = vmatprep.subr.mxu1 %v2106_v0  ;;  %p2077_p9 = por %p2076_p8, %p2075_p7 }
  0x3d   :  { %1744 = vmatpush3.msra.mxu0 %v2189_v7  ;;  %1755 = vmatpush3.msra.mxu1 %v2191_v8 }
  0x3e   :  { %1746 = vmatmul.mubr.msk.f32.vlgmr.msra.gmra.mxu0 %vm99_vm2, %v98_v9  ;;  %1757 = vmatmul.mubr.msk.f32.vlgmr.msra.gmra.mxu1 %vm99_vm2, %v97_v10  ;;  %p2078_p10 = pnand %p2077_p9, %p2071_p6 }
  0x3f   :  { %254 = vrot.lane.b32.xlu0 %v1632_v11, %s2108_s15  ;;  %259 = vrot.lane.b32.xlu1 %v98_v9, %s2100_s23 }
  0x40   :  { %1759 = vmatprep.subr.mxu0 %v2106_v0  ;;  %1767 = vmatprep.mubr.msk.f32.mxu0 %vm2107_vm1, %v2106_v0 }
  0x41   :  { %1760 = vmatpush3.msra.mxu0 %v2169_v1  ;;  %1770 = vmatprep.subr.mxu1 %v2106_v0 }
  0x42   :  { %1761 = vmatprep.subr.mxu0 %v2106_v0  ;;  %1771 = vmatpush3.msra.mxu1 %v2171_v2 }
  0x43   :  { %1762 = vmatpush3.msra.mxu0 %v2173_v3  ;;  %1772 = vmatprep.subr.mxu1 %v2106_v0 }
  0x44   :  { %1763 = vmatprep.subr.mxu0 %v2106_v0  ;;  %1773 = vmatpush3.msra.mxu1 %v2177_v4 }
  0x45   :  { %1764 = vmatpush3.msra.mxu0 %v2181_v5  ;;  %1774 = vmatprep.subr.mxu1 %v2106_v0 }
  0x46   :  { %1765 = vmatprep.subr.mxu0 %v2106_v0  ;;  %1775 = vmatpush3.msra.mxu1 %v2183_v6 }
  0x47   :  { %1766 = vmatpush3.msra.mxu0 %v2189_v7  ;;  %1776 = vmatprep.subr.mxu1 %v2106_v0 }
  0x48   :  { %1777 = vmatpush3.msra.mxu1 %v2191_v8  ;;  %1778 = vmatprep.mubr.msk.f32.mxu1 %vm2107_vm1, %v2106_v0 }
  0x49   :  { %1781 = vmatprep.subr.mxu0 %v2106_v0  ;;  %1792 = vmatprep.subr.mxu1 %v2106_v0 }
  0xb1   :  { %v2228_v12 = vpop.permute.xlu0 %254  ;;  %v260_v29 = vpop.permute.xlu1 %259 }
  0xfe   :  { %v169_v13 = vpop.f32.mrf.mxu0  ;;  %v242_v14 = vpop.f32.mrf.mxu1 }
  0xff   :  { %v243_v15 = vadd.f32 %v242_v14, %v169_v13 }
 0x100   :  { %v1747_v16 = vpop.f32.mrf.mxu0  ;;  %v1758_v17 = vpop.f32.mrf.mxu1 }
 0x101   :  { %v257_v18 = vadd.f32 %v2228_v12, %v243_v15  ;;  %v247_v22 = vadd.f32 %v246_v21, %v243_v15 }
 0x103   :  { %1926 = vtanh.f32 %v257_v18  ;;  %v1635_v23 = vmul.f32 -1.442695, %v247_v22 }
 0x105   :  { %1928 = vpow2.f32 %v1635_v23 }
 0x110   :  { %v1927_v19 = vpop.eup %1926 }
 0x111   :  { %264 = vrot.lane.b32.xlu0 %v1927_v19, %s2100_s23  ;;  %v650_v19 = vld [vmem:[#allocation7 + $0x4] sm:$0x3] }
 0x112   :  { %v1929_v24 = vpop.eup %1928 }
 0x113   :  { %v251_v25 = vadd.f32 1.0, %v1929_v24 }
 0x115   :  { %276 = vrot.lane.b32.xlu0 %v274_v20, %s2100_s23  ;;  %1930 = vrcp.f32 %v251_v25  ;;  %v627_v20 = vld [vmem:[#allocation4 + $0x4] sm:$0x3] }
 0x122   :  { %v1931_v26 = vpop.eup %1930 }
 0x123   :  { %v262_v30 = vmul.f32 %v1931_v26, %v260_v29 }
 0x183   :  { %v265_v27 = vpop.permute.xlu0 %264 }
 0x184   :  { %v267_v28 = vmul.f32 %v1931_v26, %v265_v27 }
 0x186   :  { %269 = vrot.lane.b32.xlu1 %v267_v28, %s2100_s23 }
 0x187   :  { %v277_v33 = vpop.permute.xlu0 %276 }
 0x1f8   :  { %v270_v31 = vpop.permute.xlu1 %269 }
 0x1f9   :  { %v272_v32 = vadd.f32 %v270_v31, %v262_v30 }
 0x1fb   :  { %1932 = vtanh.f32 %v272_v32 }
 0x208   :  { %v1933_v34 = vpop.eup %1932 }
 0x209   :  { %v279_v35 = vadd.f32 %v1933_v34, %v277_v33 }
 0x20b   :  { %281 = vrot.lane.b32.xlu1 %v279_v35, %s2100_s23 }
 0x20f   :  { %292 = vrot.lane.b32.xlu1 %v272_v32, %s2108_s15 }
 0x27d   :  { %v282_v36 = vpop.permute.xlu1 %281 }
 0x27e   :  { %v284_v37 = vmul.f32 %v1931_v26, %v282_v36 }
 0x280   :  { %286 = vrot.lane.b32.xlu0 %v284_v37, %s2109_s4 }
 0x281   :  { %v293_v38 = vpop.permute.xlu1 %292 }
 0x282   :  { %1768 = vmatmul.mubr.msk.f32.vlgmr.msra.gmra.mxu0 %vm99_vm2, %v293_v38 }
 0x283   :  { %1782 = vmatpush3.msra.mxu0 %v2169_v1  ;;  %1789 = vmatprep.mubr.msk.f32.mxu0 %vm2107_vm1, %v2106_v0 }
 0x284   :  { %1783 = vmatprep.subr.mxu0 %v2106_v0 }
 0x285   :  { %1784 = vmatpush3.msra.mxu0 %v2173_v3 }
 0x286   :  { %1785 = vmatprep.subr.mxu0 %v2106_v0 }
 0x287   :  { %1786 = vmatpush3.msra.mxu0 %v2181_v5 }
 0x288   :  { %1787 = vmatprep.subr.mxu0 %v2106_v0 }
 0x289   :  { %1788 = vmatpush3.msra.mxu0 %v2189_v7 }
 0x28a   :  { %1803 = vmatprep.subr.mxu0 %v2106_v0 }
 0x2f2   :  { %v287_v39 = vpop.permute.xlu0 %286 }
 0x2f3   :  { %290 = vst.msk [vmem:[#allocation12] sm:$0x3] %vm80_vm0, %v287_v39  ;;  %1779 = vmatmul.mubr.msk.f32.vlgmr.msra.gmra.mxu1 %vm99_vm2, %v287_v39 }
 0x2f4   :  { %1793 = vmatpush3.msra.mxu1 %v2171_v2  ;;  %1800 = vmatprep.mubr.msk.f32.mxu1 %vm2107_vm1, %v2106_v0 }
 0x2f5   :  { %1794 = vmatprep.subr.mxu1 %v2106_v0 }
 0x2f6   :  { %1795 = vmatpush3.msra.mxu1 %v2177_v4 }
 0x2f7   :  { %1796 = vmatprep.subr.mxu1 %v2106_v0 }
 0x2f8   :  { %1797 = vmatpush3.msra.mxu1 %v2183_v6 }
 0x2f9   :  { %1798 = vmatprep.subr.mxu1 %v2106_v0 }
 0x2fa   :  { %1799 = vmatpush3.msra.mxu1 %v2191_v8 }
 0x2fb   :  { %1814 = vmatprep.subr.mxu1 %v2106_v0 }
 0x342   :  { %v362_v40 = vpop.f32.mrf.mxu0 }
 0x344   :  { %v1769_v41 = vpop.f32.mrf.mxu0 }
 0x3b3   :  { %v434_v42 = vpop.f32.mrf.mxu1 }
 0x3b4   :  { %v435_v43 = vadd.f32 %v434_v42, %v362_v40 }
 0x3b5   :  { %v1780_v44 = vpop.f32.mrf.mxu1 }
 0x3b6   :  { %v447_v45 = vadd.f32 %v435_v43, %v2228_v12  ;;  %v440_v49 = vadd.f32 %v439_v48, %v435_v43 }
 0x3b8   :  { %1934 = vtanh.f32 %v447_v45  ;;  %v1638_v50 = vmul.f32 -1.442695, %v440_v49  ;;  %v838_v45 = vld [vmem:[#allocation7 + $0x6] sm:$0x3] }
 0x3ba   :  { %1936 = vpow2.f32 %v1638_v50 }
 0x3c5   :  { %v1935_v46 = vpop.eup %1934 }
 0x3c6   :  { %451 = vrot.lane.b32.xlu0 %v1935_v46, %s2100_s23  ;;  %v815_v46 = vld [vmem:[#allocation4 + $0x6] sm:$0x3] }
 0x3c7   :  { %v1937_v51 = vpop.eup %1936 }
 0x3c8   :  { %v444_v52 = vadd.f32 1.0, %v1937_v51 }
 0x3ca   :  { %464 = vrot.lane.b32.xlu0 %v462_v47, %s2100_s23  ;;  %1938 = vrcp.f32 %v444_v52 }
 0x3d7   :  { %v1939_v53 = vpop.eup %1938 }
 0x3d8   :  { %v449_v56 = vmul.f32 %v1939_v53, %v272_v32 }
 0x438   :  { %v452_v54 = vpop.permute.xlu0 %451 }
 0x439   :  { %v454_v55 = vmul.f32 %v1939_v53, %v452_v54 }
 0x43b   :  { %456 = vrot.lane.b32.xlu1 %v454_v55, %s2100_s23 }
 0x43c   :  { %v465_v59 = vpop.permute.xlu0 %464 }
 0x4ad   :  { %v457_v57 = vpop.permute.xlu1 %456 }
 0x4ae   :  { %v459_v58 = vadd.f32 %v457_v57, %v449_v56 }
 0x4b0   :  { %1940 = vtanh.f32 %v459_v58 }
 0x4bd   :  { %v1941_v60 = vpop.eup %1940 }
 0x4be   :  { %v467_v61 = vadd.f32 %v1941_v60, %v465_v59 }
 0x4c0   :  { %469 = vrot.lane.b32.xlu1 %v467_v61, %s2100_s23 }
 0x4c4   :  { %480 = vrot.lane.b32.xlu1 %v459_v58, %s2108_s15 }
 0x532   :  { %v470_v62 = vpop.permute.xlu1 %469 }
 0x533   :  { %v472_v63 = vmul.f32 %v1939_v53, %v470_v62 }
 0x535   :  { %474 = vrot.lane.b32.xlu0 %v472_v63, %s2109_s4 }
 0x536   :  { %v481_v9 = vpop.permute.xlu1 %480 }
 0x537   :  { %1790 = vmatmul.mubr.msk.f32.vlgmr.msra.gmra.mxu0 %vm99_vm2, %v481_v9 }
 0x538   :  { %1804 = vmatpush3.msra.mxu0 %v2169_v1  ;;  %1811 = vmatprep.mubr.msk.f32.mxu0 %vm2107_vm1, %v2106_v0 }
 0x539   :  { %1805 = vmatprep.subr.mxu0 %v2106_v0 }
 0x53a   :  { %1806 = vmatpush3.msra.mxu0 %v2173_v3 }
 0x53b   :  { %1807 = vmatprep.subr.mxu0 %v2106_v0 }
 0x53c   :  { %1808 = vmatpush3.msra.mxu0 %v2181_v5 }
 0x53d   :  { %1809 = vmatprep.subr.mxu0 %v2106_v0 }
 0x53e   :  { %1810 = vmatpush3.msra.mxu0 %v2189_v7 }
 0x53f   :  { %1825 = vmatprep.subr.mxu0 %v2106_v0 }
 0x5a7   :  { %v475_v10 = vpop.permute.xlu0 %474 }
 0x5a8   :  { %478 = vst.msk [vmem:[#allocation12 + $0x2] sm:$0x3] %vm80_vm0, %v475_v10  ;;  %1801 = vmatmul.mubr.msk.f32.vlgmr.msra.gmra.mxu1 %vm99_vm2, %v475_v10 }
 0x5a9   :  { %1815 = vmatpush3.msra.mxu1 %v2171_v2  ;;  %1822 = vmatprep.mubr.msk.f32.mxu1 %vm2107_vm1, %v2106_v0 }
 0x5aa   :  { %1816 = vmatprep.subr.mxu1 %v2106_v0 }
 0x5ab   :  { %1817 = vmatpush3.msra.mxu1 %v2177_v4 }
 0x5ac   :  { %1818 = vmatprep.subr.mxu1 %v2106_v0 }
 0x5ad   :  { %1819 = vmatpush3.msra.mxu1 %v2183_v6 }
 0x5ae   :  { %1820 = vmatprep.subr.mxu1 %v2106_v0 }
 0x5af   :  { %1821 = vmatpush3.msra.mxu1 %v2191_v8 }
 0x5b0   :  { %1836 = vmatprep.subr.mxu1 %v2106_v0 }
 0x5f7   :  { %v550_v11 = vpop.f32.mrf.mxu0 }
 0x5f9   :  { %v1791_v13 = vpop.f32.mrf.mxu0 }
 0x668   :  { %v622_v14 = vpop.f32.mrf.mxu1 }
 0x669   :  { %v623_v15 = vadd.f32 %v622_v14, %v550_v11 }
 0x66a   :  { %v1802_v16 = vpop.f32.mrf.mxu1 }
 0x66b   :  { %v635_v17 = vadd.f32 %v623_v15, %v2228_v12  ;;  %v628_v21 = vadd.f32 %v627_v20, %v623_v15 }
 0x66d   :  { %1942 = vtanh.f32 %v635_v17  ;;  %v1641_v22 = vmul.f32 -1.442695, %v628_v21  ;;  %v1026_v17 = vld [vmem:[#allocation7 + $0x8] sm:$0x3] }
 0x66f   :  { %1944 = vpow2.f32 %v1641_v22 }
 0x67a   :  { %v1943_v18 = vpop.eup %1942 }
 0x67b   :  { %639 = vrot.lane.b32.xlu0 %v1943_v18, %s2100_s23  ;;  %v1003_v18 = vld [vmem:[#allocation4 + $0x8] sm:$0x3] }
 0x67c   :  { %v1945_v23 = vpop.eup %1944 }
 0x67d   :  { %v632_v24 = vadd.f32 1.0, %v1945_v23 }
 0x67f   :  { %652 = vrot.lane.b32.xlu0 %v650_v19, %s2100_s23  ;;  %1946 = vrcp.f32 %v632_v24 }
 0x68c   :  { %v1947_v25 = vpop.eup %1946 }
 0x68d   :  { %v637_v28 = vmul.f32 %v1947_v25, %v459_v58 }
 0x6ed   :  { %v640_v26 = vpop.permute.xlu0 %639 }
 0x6ee   :  { %v642_v27 = vmul.f32 %v1947_v25, %v640_v26 }
 0x6f0   :  { %644 = vrot.lane.b32.xlu1 %v642_v27, %s2100_s23 }
 0x6f1   :  { %v653_v31 = vpop.permute.xlu0 %652 }
 0x762   :  { %v645_v29 = vpop.permute.xlu1 %644 }
 0x763   :  { %v647_v30 = vadd.f32 %v645_v29, %v637_v28 }
 0x765   :  { %1948 = vtanh.f32 %v647_v30 }
 0x772   :  { %v1949_v32 = vpop.eup %1948 }
 0x773   :  { %v655_v33 = vadd.f32 %v1949_v32, %v653_v31 }
 0x775   :  { %657 = vrot.lane.b32.xlu1 %v655_v33, %s2100_s23 }
 0x779   :  { %668 = vrot.lane.b32.xlu1 %v647_v30, %s2108_s15 }
 0x7e7   :  { %v658_v34 = vpop.permute.xlu1 %657 }
 0x7e8   :  { %v660_v35 = vmul.f32 %v1947_v25, %v658_v34 }
 0x7ea   :  { %662 = vrot.lane.b32.xlu0 %v660_v35, %s2109_s4 }
 0x7eb   :  { %v669_v36 = vpop.permute.xlu1 %668 }
 0x7ec   :  { %1812 = vmatmul.mubr.msk.f32.vlgmr.msra.gmra.mxu0 %vm99_vm2, %v669_v36 }
 0x7ed   :  { %1826 = vmatpush3.msra.mxu0 %v2169_v1  ;;  %1833 = vmatprep.mubr.msk.f32.mxu0 %vm2107_vm1, %v2106_v0 }
 0x7ee   :  { %1827 = vmatprep.subr.mxu0 %v2106_v0 }
 0x7ef   :  { %1828 = vmatpush3.msra.mxu0 %v2173_v3 }
 0x7f0   :  { %1829 = vmatprep.subr.mxu0 %v2106_v0 }
 0x7f1   :  { %1830 = vmatpush3.msra.mxu0 %v2181_v5 }
 0x7f2   :  { %1831 = vmatprep.subr.mxu0 %v2106_v0 }
 0x7f3   :  { %1832 = vmatpush3.msra.mxu0 %v2189_v7 }
 0x7f4   :  { %1847 = vmatprep.subr.mxu0 %v2106_v0 }
 0x85c   :  { %v663_v37 = vpop.permute.xlu0 %662 }
 0x85d   :  { %666 = vst.msk [vmem:[#allocation12 + $0x4] sm:$0x3] %vm80_vm0, %v663_v37  ;;  %1823 = vmatmul.mubr.msk.f32.vlgmr.msra.gmra.mxu1 %vm99_vm2, %v663_v37 }
 0x85e   :  { %1837 = vmatpush3.msra.mxu1 %v2171_v2  ;;  %1844 = vmatprep.mubr.msk.f32.mxu1 %vm2107_vm1, %v2106_v0 }
 0x85f   :  { %1838 = vmatprep.subr.mxu1 %v2106_v0 }
 0x860   :  { %1839 = vmatpush3.msra.mxu1 %v2177_v4 }
 0x861   :  { %1840 = vmatprep.subr.mxu1 %v2106_v0 }
 0x862   :  { %1841 = vmatpush3.msra.mxu1 %v2183_v6 }
 0x863   :  { %1842 = vmatprep.subr.mxu1 %v2106_v0 }
 0x864   :  { %1843 = vmatpush3.msra.mxu1 %v2191_v8 }
 0x865   :  { %1858 = vmatprep.subr.mxu1 %v2106_v0 }
 0x8ac   :  { %v738_v38 = vpop.f32.mrf.mxu0 }
 0x8ae   :  { %v1813_v39 = vpop.f32.mrf.mxu0 }
 0x91d   :  { %v810_v40 = vpop.f32.mrf.mxu1 }
 0x91e   :  { %v811_v41 = vadd.f32 %v810_v40, %v738_v38 }
 0x91f   :  { %v1824_v42 = vpop.f32.mrf.mxu1 }
 0x920   :  { %v823_v43 = vadd.f32 %v811_v41, %v2228_v12  ;;  %v816_v47 = vadd.f32 %v815_v46, %v811_v41 }
 0x922   :  { %1950 = vtanh.f32 %v823_v43  ;;  %v1644_v48 = vmul.f32 -1.442695, %v816_v47  ;;  %v1214_v43 = vld [vmem:[#allocation7 + $0xa] sm:$0x3] }
 0x924   :  { %1952 = vpow2.f32 %v1644_v48 }
 0x92f   :  { %v1951_v44 = vpop.eup %1950 }
 0x930   :  { %827 = vrot.lane.b32.xlu0 %v1951_v44, %s2100_s23  ;;  %v1191_v44 = vld [vmem:[#allocation4 + $0xa] sm:$0x3] }
 0x931   :  { %v1953_v49 = vpop.eup %1952 }
 0x932   :  { %v820_v50 = vadd.f32 1.0, %v1953_v49 }
 0x934   :  { %840 = vrot.lane.b32.xlu0 %v838_v45, %s2100_s23  ;;  %1954 = vrcp.f32 %v820_v50 }
 0x941   :  { %v1955_v51 = vpop.eup %1954 }
 0x942   :  { %v825_v54 = vmul.f32 %v1955_v51, %v647_v30 }
 0x9a2   :  { %v828_v52 = vpop.permute.xlu0 %827 }
 0x9a3   :  { %v830_v53 = vmul.f32 %v1955_v51, %v828_v52 }
 0x9a5   :  { %832 = vrot.lane.b32.xlu1 %v830_v53, %s2100_s23 }
 0x9a6   :  { %v841_v57 = vpop.permute.xlu0 %840 }
 0xa17   :  { %v833_v55 = vpop.permute.xlu1 %832 }
 0xa18   :  { %v835_v56 = vadd.f32 %v833_v55, %v825_v54 }
 0xa1a   :  { %1956 = vtanh.f32 %v835_v56 }
 0xa27   :  { %v1957_v58 = vpop.eup %1956 }
 0xa28   :  { %v843_v59 = vadd.f32 %v1957_v58, %v841_v57 }
 0xa2a   :  { %845 = vrot.lane.b32.xlu1 %v843_v59, %s2100_s23 }
 0xa2e   :  { %856 = vrot.lane.b32.xlu1 %v835_v56, %s2108_s15 }
 0xa9c   :  { %v846_v60 = vpop.permute.xlu1 %845 }
 0xa9d   :  { %v848_v61 = vmul.f32 %v1955_v51, %v846_v60 }
 0xa9f   :  { %850 = vrot.lane.b32.xlu0 %v848_v61, %s2109_s4 }
 0xaa0   :  { %v857_v62 = vpop.permute.xlu1 %856 }
 0xaa1   :  { %1834 = vmatmul.mubr.msk.f32.vlgmr.msra.gmra.mxu0 %vm99_vm2, %v857_v62 }
 0xaa2   :  { %1848 = vmatpush3.msra.mxu0 %v2169_v1  ;;  %1855 = vmatprep.mubr.msk.f32.mxu0 %vm2107_vm1, %v2106_v0 }
 0xaa3   :  { %1849 = vmatprep.subr.mxu0 %v2106_v0 }
 0xaa4   :  { %1850 = vmatpush3.msra.mxu0 %v2173_v3 }
 0xaa5   :  { %1851 = vmatprep.subr.mxu0 %v2106_v0 }
 0xaa6   :  { %1852 = vmatpush3.msra.mxu0 %v2181_v5 }
 0xaa7   :  { %1853 = vmatprep.subr.mxu0 %v2106_v0 }
 0xaa8   :  { %1854 = vmatpush3.msra.mxu0 %v2189_v7 }
 0xaa9   :  { %1869 = vmatprep.subr.mxu0 %v2106_v0 }
 0xb11   :  { %v851_v63 = vpop.permute.xlu0 %850 }
 0xb12   :  { %854 = vst.msk [vmem:[#allocation12 + $0x6] sm:$0x3] %vm80_vm0, %v851_v63  ;;  %1845 = vmatmul.mubr.msk.f32.vlgmr.msra.gmra.mxu1 %vm99_vm2, %v851_v63 }
 0xb13   :  { %1859 = vmatpush3.msra.mxu1 %v2171_v2  ;;  %1866 = vmatprep.mubr.msk.f32.mxu1 %vm2107_vm1, %v2106_v0 }
 0xb14   :  { %1860 = vmatprep.subr.mxu1 %v2106_v0 }
 0xb15   :  { %1861 = vmatpush3.msra.mxu1 %v2177_v4 }
 0xb16   :  { %1862 = vmatprep.subr.mxu1 %v2106_v0 }
 0xb17   :  { %1863 = vmatpush3.msra.mxu1 %v2183_v6 }
 0xb18   :  { %1864 = vmatprep.subr.mxu1 %v2106_v0 }
 0xb19   :  { %1865 = vmatpush3.msra.mxu1 %v2191_v8 }
 0xb1a   :  { %1880 = vmatprep.subr.mxu1 %v2106_v0 }
 0xb61   :  { %v926_v9 = vpop.f32.mrf.mxu0 }
 0xb63   :  { %v1835_v10 = vpop.f32.mrf.mxu0 }
 0xbd2   :  { %v998_v11 = vpop.f32.mrf.mxu1 }
 0xbd3   :  { %v999_v13 = vadd.f32 %v998_v11, %v926_v9  ;;  %v1379_v9 = vld [vmem:[#allocation4 + $0xc] sm:$0x3] }
 0xbd4   :  { %v1846_v14 = vpop.f32.mrf.mxu1 }
 0xbd5   :  { %v1011_v15 = vadd.f32 %v999_v13, %v2228_v12  ;;  %v1004_v19 = vadd.f32 %v1003_v18, %v999_v13 }
 0xbd7   :  { %1958 = vtanh.f32 %v1011_v15  ;;  %v1647_v20 = vmul.f32 -1.442695, %v1004_v19 }
 0xbd9   :  { %1960 = vpow2.f32 %v1647_v20 }
 0xbe4   :  { %v1959_v16 = vpop.eup %1958 }
 0xbe5   :  { %1015 = vrot.lane.b32.xlu0 %v1959_v16, %s2100_s23 }
 0xbe6   :  { %v1961_v21 = vpop.eup %1960 }
 0xbe7   :  { %v1008_v22 = vadd.f32 1.0, %v1961_v21 }
 0xbe9   :  { %1028 = vrot.lane.b32.xlu0 %v1026_v17, %s2100_s23  ;;  %1962 = vrcp.f32 %v1008_v22 }
 0xbf6   :  { %v1963_v23 = vpop.eup %1962 }
 0xbf7   :  { %v1013_v26 = vmul.f32 %v1963_v23, %v835_v56 }
 0xc57   :  { %v1016_v24 = vpop.permute.xlu0 %1015 }
 0xc58   :  { %v1018_v25 = vmul.f32 %v1963_v23, %v1016_v24 }
 0xc5a   :  { %1020 = vrot.lane.b32.xlu1 %v1018_v25, %s2100_s23 }
 0xc5b   :  { %v1029_v29 = vpop.permute.xlu0 %1028 }
 0xccc   :  { %v1021_v27 = vpop.permute.xlu1 %1020 }
 0xccd   :  { %v1023_v28 = vadd.f32 %v1021_v27, %v1013_v26 }
 0xccf   :  { %1964 = vtanh.f32 %v1023_v28 }
 0xcdc   :  { %v1965_v30 = vpop.eup %1964 }
 0xcdd   :  { %v1031_v31 = vadd.f32 %v1965_v30, %v1029_v29 }
 0xcdf   :  { %1033 = vrot.lane.b32.xlu1 %v1031_v31, %s2100_s23 }
 0xce3   :  { %1044 = vrot.lane.b32.xlu1 %v1023_v28, %s2108_s15 }
 0xd51   :  { %v1034_v32 = vpop.permute.xlu1 %1033 }
 0xd52   :  { %v1036_v33 = vmul.f32 %v1963_v23, %v1034_v32  ;;  %v1590_v32 = vld [vmem:[#allocation7 + $0xe] sm:$0x3] }
 0xd54   :  { %1038 = vrot.lane.b32.xlu0 %v1036_v33, %s2109_s4  ;;  %v1567_v33 = vld [vmem:[#allocation4 + $0xe] sm:$0x3] }
 0xd55   :  { %v1045_v34 = vpop.permute.xlu1 %1044 }
 0xd56   :  { %1856 = vmatmul.mubr.msk.f32.vlgmr.msra.gmra.mxu0 %vm99_vm2, %v1045_v34 }
 0xd57   :  { %1870 = vmatpush3.msra.mxu0 %v2169_v1  ;;  %1877 = vmatprep.mubr.msk.f32.mxu0 %vm2107_vm1, %v2106_v0 }
 0xd58   :  { %1871 = vmatprep.subr.mxu0 %v2106_v0 }
 0xd59   :  { %1872 = vmatpush3.msra.mxu0 %v2173_v3 }
 0xd5a   :  { %1873 = vmatprep.subr.mxu0 %v2106_v0 }
 0xd5b   :  { %1874 = vmatpush3.msra.mxu0 %v2181_v5 }
 0xd5c   :  { %1875 = vmatprep.subr.mxu0 %v2106_v0 }
 0xd5d   :  { %1876 = vmatpush3.msra.mxu0 %v2189_v7 }
 0xd5e   :  { %1891 = vmatprep.subr.mxu0 %v2106_v0 }
 0xdc6   :  { %v1039_v35 = vpop.permute.xlu0 %1038 }
 0xdc7   :  { %1042 = vst.msk [vmem:[#allocation12 + $0x8] sm:$0x3] %vm80_vm0, %v1039_v35  ;;  %1867 = vmatmul.mubr.msk.f32.vlgmr.msra.gmra.mxu1 %vm99_vm2, %v1039_v35 }
 0xdc8   :  { %1881 = vmatpush3.msra.mxu1 %v2171_v2  ;;  %1888 = vmatprep.mubr.msk.f32.mxu1 %vm2107_vm1, %v2106_v0 }
 0xdc9   :  { %1882 = vmatprep.subr.mxu1 %v2106_v0 }
 0xdca   :  { %1883 = vmatpush3.msra.mxu1 %v2177_v4 }
 0xdcb   :  { %1884 = vmatprep.subr.mxu1 %v2106_v0 }
 0xdcc   :  { %1885 = vmatpush3.msra.mxu1 %v2183_v6 }
 0xdcd   :  { %1886 = vmatprep.subr.mxu1 %v2106_v0 }
 0xdce   :  { %1887 = vmatpush3.msra.mxu1 %v2191_v8 }
 0xdcf   :  { %1902 = vmatprep.subr.mxu1 %v2106_v0 }
 0xe16   :  { %v1114_v36 = vpop.f32.mrf.mxu0 }
 0xe18   :  { %v1857_v37 = vpop.f32.mrf.mxu0 }
 0xe87   :  { %v1186_v38 = vpop.f32.mrf.mxu1 }
 0xe88   :  { %v1187_v39 = vadd.f32 %v1186_v38, %v1114_v36 }
 0xe89   :  { %v1868_v40 = vpop.f32.mrf.mxu1 }
 0xe8a   :  { %v1199_v41 = vadd.f32 %v1187_v39, %v2228_v12  ;;  %v1192_v45 = vadd.f32 %v1191_v44, %v1187_v39 }
 0xe8c   :  { %1966 = vtanh.f32 %v1199_v41  ;;  %v1650_v46 = vmul.f32 -1.442695, %v1192_v45 }
 0xe8e   :  { %1968 = vpow2.f32 %v1650_v46 }
 0xe99   :  { %v1967_v42 = vpop.eup %1966 }
 0xe9a   :  { %1203 = vrot.lane.b32.xlu0 %v1967_v42, %s2100_s23 }
 0xe9b   :  { %v1969_v47 = vpop.eup %1968 }
 0xe9c   :  { %v1196_v48 = vadd.f32 1.0, %v1969_v47 }
 0xe9e   :  { %1216 = vrot.lane.b32.xlu0 %v1214_v43, %s2100_s23  ;;  %1970 = vrcp.f32 %v1196_v48 }
 0xeab   :  { %v1971_v49 = vpop.eup %1970 }
 0xeac   :  { %v1201_v52 = vmul.f32 %v1971_v49, %v1023_v28 }
 0xf0c   :  { %v1204_v50 = vpop.permute.xlu0 %1203 }
 0xf0d   :  { %v1206_v51 = vmul.f32 %v1971_v49, %v1204_v50 }
 0xf0f   :  { %1208 = vrot.lane.b32.xlu1 %v1206_v51, %s2100_s23 }
 0xf10   :  { %v1217_v55 = vpop.permute.xlu0 %1216 }
 0xf81   :  { %v1209_v53 = vpop.permute.xlu1 %1208 }
 0xf82   :  { %v1211_v54 = vadd.f32 %v1209_v53, %v1201_v52 }
 0xf84   :  { %1972 = vtanh.f32 %v1211_v54 }
 0xf91   :  { %v1973_v56 = vpop.eup %1972 }
 0xf92   :  { %v1219_v57 = vadd.f32 %v1973_v56, %v1217_v55 }
 0xf94   :  { %1221 = vrot.lane.b32.xlu1 %v1219_v57, %s2100_s23 }
 0xf98   :  { %1232 = vrot.lane.b32.xlu1 %v1211_v54, %s2108_s15 }
0x1006   :  { %v1222_v58 = vpop.permute.xlu1 %1221 }
0x1007   :  { %v1224_v59 = vmul.f32 %v1971_v49, %v1222_v58 }
0x1009   :  { %1226 = vrot.lane.b32.xlu0 %v1224_v59, %s2109_s4 }
0x100a   :  { %v1233_v60 = vpop.permute.xlu1 %1232 }
0x100b   :  { %1878 = vmatmul.mubr.msk.f32.vlgmr.msra.gmra.mxu0 %vm99_vm2, %v1233_v60 }
0x100c   :  { %1892 = vmatpush3.msra.mxu0 %v2169_v1  ;;  %1899 = vmatprep.mubr.msk.f32.mxu0 %vm2107_vm1, %v2106_v0 }
0x100d   :  { %1893 = vmatprep.subr.mxu0 %v2106_v0 }
0x100e   :  { %1894 = vmatpush3.msra.mxu0 %v2173_v3 }
0x100f   :  { %1895 = vmatprep.subr.mxu0 %v2106_v0 }
0x1010   :  { %1896 = vmatpush3.msra.mxu0 %v2181_v5 }
0x1011   :  { %1897 = vmatprep.subr.mxu0 %v2106_v0 }
0x1012   :  { %1898 = vmatpush3.msra.mxu0 %v2189_v7 }
0x107b   :  { %v1227_v61 = vpop.permute.xlu0 %1226 }
0x107c   :  { %1230 = vst.msk [vmem:[#allocation12 + $0xa] sm:$0x3] %vm80_vm0, %v1227_v61  ;;  %1889 = vmatmul.mubr.msk.f32.vlgmr.msra.gmra.mxu1 %vm99_vm2, %v1227_v61 }
0x107d   :  { %1903 = vmatpush3.msra.mxu1 %v2171_v2  ;;  %1910 = vmatprep.mubr.msk.f32.mxu1 %vm2107_vm1, %v2106_v0 }
0x107e   :  { %1904 = vmatprep.subr.mxu1 %v2106_v0 }
0x107f   :  { %1905 = vmatpush3.msra.mxu1 %v2177_v4  ;;  %v1402_v4 = vld [vmem:[#allocation7 + $0xc] sm:$0x3] }
0x1080   :  { %1906 = vmatprep.subr.mxu1 %v2106_v0 }
0x1081   :  { %1907 = vmatpush3.msra.mxu1 %v2183_v6 }
0x1082   :  { %1908 = vmatprep.subr.mxu1 %v2106_v0 }
0x1083   :  { %1909 = vmatpush3.msra.mxu1 %v2191_v8 }
0x10cb   :  { %v1302_v1 = vpop.f32.mrf.mxu0 }
0x10cd   :  { %v1879_v3 = vpop.f32.mrf.mxu0 }
0x113c   :  { %v1374_v5 = vpop.f32.mrf.mxu1 }
0x113d   :  { %v1375_v7 = vadd.f32 %v1374_v5, %v1302_v1 }
0x113e   :  { %v1890_v2 = vpop.f32.mrf.mxu1 }
0x113f   :  { %v1387_v62 = vadd.f32 %v1375_v7, %v2228_v12  ;;  %v1380_v6 = vadd.f32 %v1379_v9, %v1375_v7 }
0x1141   :  { %1974 = vtanh.f32 %v1387_v62  ;;  %v1653_v10 = vmul.f32 -1.442695, %v1380_v6 }
0x1143   :  { %1976 = vpow2.f32 %v1653_v10 }
0x114e   :  { %v1975_v63 = vpop.eup %1974 }
0x114f   :  { %1391 = vrot.lane.b32.xlu0 %v1975_v63, %s2100_s23 }
0x1150   :  { %v1977_v0 = vpop.eup %1976 }
0x1151   :  { %v1384_v8 = vadd.f32 1.0, %v1977_v0 }
0x1153   :  { %1404 = vrot.lane.b32.xlu0 %v1402_v4, %s2100_s23  ;;  %1978 = vrcp.f32 %v1384_v8 }
0x1160   :  { %v1979_v11 = vpop.eup %1978 }
0x1161   :  { %v1389_v15 = vmul.f32 %v1979_v11, %v1211_v54 }
0x11c1   :  { %v1392_v13 = vpop.permute.xlu0 %1391 }
0x11c2   :  { %v1394_v14 = vmul.f32 %v1979_v11, %v1392_v13 }
0x11c4   :  { %1396 = vrot.lane.b32.xlu1 %v1394_v14, %s2100_s23 }
0x11c5   :  { %v1405_v18 = vpop.permute.xlu0 %1404 }
0x1236   :  { %v1397_v16 = vpop.permute.xlu1 %1396 }
0x1237   :  { %v1399_v17 = vadd.f32 %v1397_v16, %v1389_v15 }
0x1239   :  { %1980 = vtanh.f32 %v1399_v17 }
0x1246   :  { %v1981_v19 = vpop.eup %1980 }
0x1247   :  { %v1407_v20 = vadd.f32 %v1981_v19, %v1405_v18 }
0x1249   :  { %1409 = vrot.lane.b32.xlu1 %v1407_v20, %s2100_s23 }
0x124d   :  { %1420 = vrot.lane.b32.xlu1 %v1399_v17, %s2108_s15 }
0x12bb   :  { %v1410_v21 = vpop.permute.xlu1 %1409 }
0x12bc   :  { %v1412_v22 = vmul.f32 %v1979_v11, %v1410_v21 }
0x12be   :  { %1414 = vrot.lane.b32.xlu0 %v1412_v22, %s2109_s4 }
0x12bf   :  { %v1421_v23 = vpop.permute.xlu1 %1420 }
0x12c0   :  { %1900 = vmatmul.mubr.msk.f32.vlgmr.msra.gmra.mxu0 %vm99_vm2, %v1421_v23 }
0x1330   :  { %v1415_v24 = vpop.permute.xlu0 %1414 }
0x1331   :  { %1418 = vst.msk [vmem:[#allocation12 + $0xc] sm:$0x3] %vm80_vm0, %v1415_v24  ;;  %1911 = vmatmul.mubr.msk.f32.vlgmr.msra.gmra.mxu1 %vm99_vm2, %v1415_v24 }
0x1380   :  { %v1490_v25 = vpop.f32.mrf.mxu0 }
0x1382   :  { %v1901_v26 = vpop.f32.mrf.mxu0 }
0x13f1   :  { %v1562_v27 = vpop.f32.mrf.mxu1 }
0x13f2   :  { %v1563_v28 = vadd.f32 %v1562_v27, %v1490_v25 }
0x13f3   :  { %v1912_v29 = vpop.f32.mrf.mxu1 }
0x13f4   :  { %v1575_v30 = vadd.f32 %v1563_v28, %v2228_v12  ;;  %v1568_v34 = vadd.f32 %v1567_v33, %v1563_v28 }
0x13f6   :  { %1982 = vtanh.f32 %v1575_v30  ;;  %v1656_v35 = vmul.f32 -1.442695, %v1568_v34 }
0x13f8   :  { %1984 = vpow2.f32 %v1656_v35 }
0x1403   :  { %v1983_v31 = vpop.eup %1982 }
0x1404   :  { %1579 = vrot.lane.b32.xlu0 %v1983_v31, %s2100_s23 }
0x1405   :  { %v1985_v36 = vpop.eup %1984 }
0x1406   :  { %v1572_v37 = vadd.f32 1.0, %v1985_v36 }
0x1408   :  { %1592 = vrot.lane.b32.xlu0 %v1590_v32, %s2100_s23  ;;  %1986 = vrcp.f32 %v1572_v37 }
0x1415   :  { %v1987_v38 = vpop.eup %1986 }
0x1416   :  { %v1577_v12 = vmul.f32 %v1987_v38, %v1399_v17 }
0x1476   :  { %v1580_v39 = vpop.permute.xlu0 %1579 }
0x1477   :  { %v1582_v40 = vmul.f32 %v1987_v38, %v1580_v39 }
0x1479   :  { %1584 = vrot.lane.b32.xlu1 %v1582_v40, %s2100_s23 }
0x147a   :  { %v1593_v43 = vpop.permute.xlu0 %1592 }
0x14eb   :  { %v1585_v41 = vpop.permute.xlu1 %1584 }
0x14ec   :  { %v1587_v42 = vadd.f32 %v1585_v41, %v1577_v12 }
0x14ee   :  { %1988 = vtanh.f32 %v1587_v42 }
0x14fb   :  { %v1989_v44 = vpop.eup %1988 }
0x14fc   :  { %v1595_v45 = vadd.f32 %v1989_v44, %v1593_v43 }
0x14fe   :  { %1597 = vrot.lane.b32.xlu1 %v1595_v45, %s2100_s23 }
0x1502   :  { %1609 = vrot.lane.b32.xlu1 %v1587_v42, %s2108_s15 }
0x1570   :  { %v1598_v46 = vpop.permute.xlu1 %1597 }
0x1571   :  { %v1600_v47 = vmul.f32 %v1987_v38, %v1598_v46 }
0x1573   :  { %1602 = vrot.lane.b32.xlu0 %v1600_v47, %s2109_s4 }
0x1574   :  { %v1610_v48 = vpop.permute.xlu1 %1609 }
0x1575   :  { %1612 = vst.msk [vmem:[#allocation3] sm:$0x3] %vm80_vm0, %v1610_v48 }
0x15e5   :  { %v1603_v49 = vpop.permute.xlu0 %1602 }
0x15e6   :  { %1606 = vst.msk [vmem:[#allocation12 + $0xe] sm:$0x3] %vm80_vm0, %v1603_v49  ;;  %1607 = vst.msk [vmem:[#allocation2] sm:$0x3] %vm80_vm0, %v1603_v49 }
0x15e7   :  { %2081 = shalt.err (!%p2078_p10)
}
0x15e8   :  { %1624 = dma.vmem_to_hbm [thread:$0]  %s1619_s17, 256, %s2439_s5, [#allocation6], %s2100_s23, %s2100_s23, %s2101_s24  }
0x15e9   :  { %2096 = dma.done.wait [#allocation6], 256  }
0x15ea   :  { %2097 = vsyncadd [#allocation6], 4294967040 }
0x15eb   :  { %1628 = vsyncpa [#allocation5], 1 }
0x15ec   :  { %1629 = vsyncpa [#allocation8], 1 }
0x15ed   :  { %1630 = vsyncpa [#allocation11], 1 }
0x15ee   :  { %1631 = vsyncpa [#allocation6], 1 }

</bundles_post_ra>
